<compile_context>
chip_gen: v7x
topology: tpu7x:2x2x1
jax: 0.10.0
libtpu: 0.0.40
codegen_flags: <defaults>
</compile_context>

<pallas_src>
import functools

import jax
import jax.numpy as jnp
from jax.experimental import pallas as pl
from jax.experimental.pallas import tpu as pltpu


def _round_up(x, m):
    return (x + m - 1) // m * m


def _pick_tile():
    """256-wide output-channel tiles on v6e/v7x (2x256^2 MXU); 128 on v5e."""
    try:
        kind = jax.devices()[0].device_kind.lower()
        if "v5 lite" in kind or "v5e" in kind or "v5litepod" in kind:
            return 128
    except Exception:
        pass
    return 256


_TILE = _pick_tile()


# ---------------------------------------------------------------------------
# Pallas kernel: fused conv (in-kernel im2col) + bias + optional ReLU.
#   x_ref : (1, Lp, C)   bf16  padded image, spatial flattened row-major
#   w_ref : (T, C, tn)   bf16  per-tap weights, BN scale pre-folded
#   b_ref : (1, tn)      f32   folded BN bias
#   o_ref : (1, Lq, tn)  bf16  output (Lq = Ho*Wp; garbage columns sliced off
#                              by the host-side glue)
# For tap t at flattened offset `off`, output position q reads input position
# q + off, so each tap is a plain (Lq, C) x (C, tn) matmul on a shifted
# row-window of the VMEM-resident activation -- no HBM im2col.
# ---------------------------------------------------------------------------
def _conv_kernel(x_ref, w_ref, b_ref, o_ref, *, taps, lq, apply_relu):
    acc = None
    for t, off in enumerate(taps):
        a = x_ref[0, off:off + lq, :]                       # (Lq, C) bf16
        d = jnp.dot(a, w_ref[t], preferred_element_type=jnp.float32)
        acc = d if acc is None else acc + d
    y = acc + b_ref[...]                                    # (Lq, tn) f32
    if apply_relu:
        y = jnp.maximum(y, 0.0)
    o_ref[0] = y.astype(o_ref.dtype)


def _pick_tn(cout):
    if cout <= 256:
        return cout                       # full dim -> no 128 constraint
    if cout % _TILE == 0:
        return _TILE
    return 128


def fused_conv(xf, B, bias, *, taps, lq, relu):
    """xf: (N, Lp, C) bf16; B: (T, C, Cout) bf16; bias: (1, Cout) f32.
    Returns (N, Lq, Cout) bf16."""
    N, Lp, C = xf.shape
    T, Cb, Cout = B.shape
    assert Cb == C and T == len(taps)
    tn = _pick_tn(Cout)
    J = Cout // tn

    # Grid order: keep the larger operand constant across the inner axis so it
    # is streamed from HBM exactly once (review: weight re-streaming).
    x_bytes = N * Lp * C * 2
    w_bytes = T * C * Cout * 2
    weights_outer = (J - 1) * x_bytes < (N - 1) * w_bytes
    if weights_outer:
        grid = (J, N)
        x_map = lambda j, n: (n, 0, 0)
        w_map = lambda j, n: (0, 0, j)
        b_map = lambda j, n: (0, j)
        o_map = lambda j, n: (n, 0, j)
    else:
        grid = (N, J)
        x_map = lambda n, j: (n, 0, 0)
        w_map = lambda n, j: (0, 0, j)
        b_map = lambda n, j: (0, j)
        o_map = lambda n, j: (n, 0, j)

    # Explicit VMEM budget: double-buffered blocks + f32 accumulator temps,
    # with margin for (16,128) tiling inflation of narrow dims.
    x_blk = Lp * C * 2
    w_blk = T * C * tn * 2
    o_blk = lq * tn * 2
    acc_tmp = lq * tn * 4 * 2
    need = 2 * (x_blk + w_blk + o_blk + tn * 4) + acc_tmp + (4 << 20)
    vmem_limit = int(min(48 << 20, max(need, 24 << 20)))

    kernel = functools.partial(_conv_kernel, taps=tuple(taps), lq=lq,
                               apply_relu=relu)
    return pl.pallas_call(
        kernel,
        out_shape=jax.ShapeDtypeStruct((N, lq, Cout), jnp.bfloat16),
        grid_spec=pltpu.PrefetchScalarGridSpec(
            num_scalar_prefetch=0,
            grid=grid,
            in_specs=[
                pl.BlockSpec((1, Lp, C), x_map),
                pl.BlockSpec((T, C, tn), w_map),
                pl.BlockSpec((1, tn), b_map),
            ],
            out_specs=pl.BlockSpec((1, lq, tn), o_map),
        ),
        compiler_params=pltpu.CompilerParams(
            dimension_semantics=("parallel", "parallel"),
            vmem_limit_bytes=vmem_limit),
    )(xf, B, bias)


# ---------------------------------------------------------------------------
# Glue: spatial zero-pad + flatten, call the fused kernel, slice the valid
# output columns.  Activations stay NHWC bf16 between layers.
# ---------------------------------------------------------------------------
def conv_bn_act(x, wp, *, stride=1, dilation=1, relu=True):
    B, bias = wp['B'], wp['bias']
    T, cin_p, cout = B.shape
    k = int(round(T ** 0.5))              # square kernels only (1 / 3 / 7)
    N, H, W, C = x.shape
    if C < cin_p:                          # stem: 3 -> 16 input channels
        x = jnp.pad(x, ((0, 0), (0, 0), (0, 0), (0, cin_p - C)))

    if k == 1:
        if stride > 1:                     # 1x1 strided: subsample input (exact)
            x = x[:, ::stride, ::stride, :]
        N, H, W, _ = x.shape
        xp, Hp, Wp = x, H, W
    else:
        p = dilation * (k // 2)
        # +1 extra zero row at the bottom keeps the last tap's flattened
        # window in-bounds; it only feeds the (discarded) wrap-around columns.
        xp = jnp.pad(x, ((0, 0), (p, p + 1), (p, p), (0, 0)))
        Hp, Wp = H + 2 * p + 1, W + 2 * p
    Ho, Wo = H, W                          # stride-1 compute
    Lp, Lq = Hp * Wp, Ho * Wp
    taps = tuple(dilation * (ki * Wp + kj)
                 for ki in range(k) for kj in range(k))
    y = fused_conv(xp.reshape(N, Lp, cin_p), B, bias,
                   taps=taps, lq=Lq, relu=relu)              # (N, Lq, Cout)
    y = y.reshape(N, Ho, Wp, cout)[:, :, :Wo, :]
    if k > 1 and stride > 1:               # strided 3x3: subsample output
        y = y[:, ::stride, ::stride, :]
    return y


# ---------------------------------------------------------------------------
# Deterministic parameter init + one-time (outside-jit) weight preprocessing.
# ---------------------------------------------------------------------------
class _ParamGen:
    def __init__(self, key):
        self.key = key
        self.count = 0

    def conv_bn(self, cin, cout, k):
        keys = jax.random.split(jax.random.fold_in(self.key, self.count), 5)
        self.count += 1
        std = (2.0 / (cin * k * k)) ** 0.5
        return dict(
            w=std * jax.random.normal(keys[0], (cout, cin, k, k), jnp.float32),
            gamma=1.0 + 0.1 * jax.random.normal(keys[1], (cout,), jnp.float32),
            beta=0.1 * jax.random.normal(keys[2], (cout,), jnp.float32),
            mean=0.1 * jax.random.normal(keys[3], (cout,), jnp.float32),
            var=jnp.abs(1.0 + 0.1 * jax.random.normal(keys[4], (cout,),
                                                      jnp.float32)),
        )


def init_params(key):
    pg = _ParamGen(key)
    p = {}
    p['layer0'] = pg.conv_bn(3, 16, 7)            # 7x7 stem conv
    p['layer1_0'] = pg.conv_bn(16, 16, 3)
    p['layer2_0'] = pg.conv_bn(16, 32, 3)

    def res_layer(name, cin, cout):
        p[name + '_b0_conv1'] = pg.conv_bn(cin, cout, 3)
        p[name + '_b0_conv2'] = pg.conv_bn(cout, cout, 3)
        p[name + '_b0_down'] = pg.conv_bn(cin, cout, 1)
        p[name + '_b1_conv1'] = pg.conv_bn(cout, cout, 3)
        p[name + '_b1_conv2'] = pg.conv_bn(cout, cout, 3)

    res_layer('layer3', 32, 64)
    res_layer('layer4', 64, 128)
    res_layer('layer5', 128, 256)
    res_layer('layer6', 256, 512)
    p['layer7_0'] = pg.conv_bn(512, 512, 3)       # dilation 2
    p['layer8_0'] = pg.conv_bn(512, 512, 3)       # dilation 1
    return p


def prepare_params(raw):
    """Run ONCE, eagerly, outside jit: fold BN scale into bf16 weights,
    lay out as (kh*kw, Cin, Cout), keep bias only; no K/Cout padding."""
    eps = 1e-5
    prepared = {}
    for name, p in raw.items():
        w = p['w']                                     # (Cout, Cin, kh, kw)
        cout, cin, kh, kw = w.shape
        scale = p['gamma'] / jnp.sqrt(p['var'] + eps)
        bias = p['beta'] - p['mean'] * scale
        wf = w * scale[:, None, None, None]            # fold BN scale
        B = jnp.transpose(wf, (2, 3, 1, 0)).reshape(kh * kw, cin, cout)
        cin_p = _round_up(cin, 16)                     # only the 3-ch stem pads
        if cin_p != cin:
            B = jnp.pad(B, ((0, 0), (0, cin_p - cin), (0, 0)))
        prepared[name] = dict(
            B=B.astype(jnp.bfloat16),
            bias=bias.reshape(1, cout).astype(jnp.float32),
        )
    return prepared


# ---------------------------------------------------------------------------
# Forward pass of my_model: lower_res = self.conv(image)   (DRN-D-22[:-2])
# ---------------------------------------------------------------------------
@jax.jit
def my_model_forward(image_nchw, params):
    x = jnp.transpose(image_nchw, (0, 2, 3, 1)).astype(jnp.bfloat16)   # NHWC

    x = conv_bn_act(x, params['layer0'])                    # 7x7 stem
    x = conv_bn_act(x, params['layer1_0'])                  # 3x3 s1
    x = conv_bn_act(x, params['layer2_0'], stride=2)        # 3x3 s2

    def basic_block(x, prefix, stride, dil, has_down):
        out = conv_bn_act(x, params[prefix + '_conv1'], stride=stride,
                          dilation=dil)
        if has_down:
            res = conv_bn_act(x, params[prefix + '_down'], stride=stride,
                              relu=False)
        else:
            res = x
        out = conv_bn_act(out, params[prefix + '_conv2'], stride=1,
                          dilation=dil, relu=False)
        # TODO(synk): fuse residual add + ReLU into the kernel epilogue (needs
        # the residual pre-padded into the Lq = Ho*Wp layout).
        return jnp.maximum(out + res, 0).astype(jnp.bfloat16)

    x = basic_block(x, 'layer3_b0', 2, 1, True)
    x = basic_block(x, 'layer3_b1', 1, 1, False)
    x = basic_block(x, 'layer4_b0', 2, 1, True)
    x = basic_block(x, 'layer4_b1', 1, 1, False)
    x = basic_block(x, 'layer5_b0', 1, 2, True)
    x = basic_block(x, 'layer5_b1', 1, 2, False)
    x = basic_block(x, 'layer6_b0', 1, 4, True)
    x = basic_block(x, 'layer6_b1', 1, 4, False)

    x = conv_bn_act(x, params['layer7_0'], dilation=2)
    x = conv_bn_act(x, params['layer8_0'], dilation=1)

    # Original forward body ends at `lower_res = self.conv(image)`; the other
    # submodules are never invoked.  Return lower_res (NCHW, f32).
    return jnp.transpose(x, (0, 3, 1, 2)).astype(jnp.float32)


# ---------------------------------------------------------------------------
# Correctness spot-check of the fused kernel against XLA's native conv.
# ---------------------------------------------------------------------------
def _check_conv_against_xla(key, k, dilation, stride, cin=32, cout=64,
                            H=12, W=12):
    pg = _ParamGen(key)
    wp = prepare_params({'t': pg.conv_bn(cin, cout, k)})['t']
    x = jax.random.normal(jax.random.fold_in(key, 99), (2, H, W, cin),
                          jnp.float32).astype(jnp.bfloat16)
    y = conv_bn_act(x, wp, stride=stride, dilation=dilation, relu=True)
    w_hwio = wp['B'].reshape(k, k, wp['B'].shape[1], cout).astype(jnp.float32)
    pad = dilation * (k // 2)
    ref = jax.lax.conv_general_dilated(
        x.astype(jnp.float32), w_hwio, window_strides=(stride, stride),
        padding=((pad, pad), (pad, pad)), rhs_dilation=(dilation, dilation),
        dimension_numbers=('NHWC', 'HWIO', 'NHWC'))
    ref = jnp.maximum(ref + wp['bias'][0], 0.0)
    err = float(jnp.max(jnp.abs(y.astype(jnp.float32) - ref)))
    tol = 0.05 * max(1.0, float(jnp.max(jnp.abs(ref))))
    assert err <= tol, ("fused conv mismatch", k, dilation, stride, err, tol)


if __name__ == "__main__":
    key = jax.random.PRNGKey(0)
    pkey, xkey, ckey = jax.random.split(key, 3)

    # Spot-check the fused conv kernel on the kernel/dilation/stride variants
    # used by the backbone (3x3 d1, 3x3 d2, 3x3 s2, 1x1 s2, 7x7 stem).
    for idx, (k, dil, s) in enumerate([(3, 1, 1), (3, 2, 1), (3, 1, 2),
                                       (1, 1, 2), (7, 1, 1)]):
        _check_conv_against_xla(jax.random.fold_in(ckey, idx), k, dil, s)

    raw_params = init_params(pkey)
    params = prepare_params(raw_params)          # one-time, outside jit

    # small RGB image consistent with the backbone's input
    image = jax.random.normal(xkey, (2, 3, 32, 32), jnp.float32)

    out = my_model_forward(image, params)
    out = jax.block_until_ready(out)
    assert out.shape == (2, 512, 4, 4), out.shape
    assert bool(jnp.all(jnp.isfinite(out)))
    print("KERNEL_OK")
</pallas_src>

<mosaic_0001>
module attributes {stable_mosaic.version = 11 : i64} {
  func.func @_conv_kernel(%arg0: i32, %arg1: i32, %arg2: memref<1x210x32xbf16, #tpu.memory_space<vmem>>, %arg3: memref<9x32x64xbf16, #tpu.memory_space<vmem>>, %arg4: memref<1x64xf32, #tpu.memory_space<vmem>>, %arg5: memref<1x168x64xbf16, #tpu.memory_space<vmem>>) attributes {dimension_semantics = [#tpu.dimension_semantics<parallel>, #tpu.dimension_semantics<parallel>], iteration_bounds = array<i64: 1, 2>, scalar_prefetch = 0 : i64, scratch_operands = 0 : i64, tpu.core_type = #tpu.core_type<tc>, window_params = [{transform_indices = @transform_0, window_bounds = array<i64: 1, 210, 32>}, {transform_indices = @transform_1, window_bounds = array<i64: 9, 32, 64>}, {transform_indices = @transform_2, window_bounds = array<i64: 1, 64>}, {transform_indices = @transform_3, window_bounds = array<i64: 1, 168, 64>}]} {
    %c0 = arith.constant 0 : index
    %c0_0 = arith.constant 0 : index
    %c0_1 = arith.constant 0 : index
    %0 = vector.load %arg2[%c0, %c0_0, %c0_1] : memref<1x210x32xbf16, #tpu.memory_space<vmem>>, vector<1x168x32xbf16>
    %1 = vector.shape_cast %0 : vector<1x168x32xbf16> to vector<168x32xbf16>
    %c0_2 = arith.constant 0 : index
    %c0_3 = arith.constant 0 : index
    %c0_4 = arith.constant 0 : index
    %2 = vector.load %arg3[%c0_2, %c0_3, %c0_4] : memref<9x32x64xbf16, #tpu.memory_space<vmem>>, vector<1x32x64xbf16>
    %3 = vector.shape_cast %2 : vector<1x32x64xbf16> to vector<32x64xbf16>
    %cst = arith.constant dense<0.000000e+00> : vector<168x64xf32>
    %4 = tpu.matmul %1, %3, %cst {dimension_numbers = #tpu.dot_dimension_numbers<[1], [0], [0], [1], [0, 0, 1, 1], [], []>} : vector<168x32xbf16>, vector<32x64xbf16>, vector<168x64xf32> -> vector<168x64xf32>
    %c0_5 = arith.constant 0 : index
    %c1 = arith.constant 1 : index
    %c0_6 = arith.constant 0 : index
    %5 = vector.load %arg2[%c0_5, %c1, %c0_6] : memref<1x210x32xbf16, #tpu.memory_space<vmem>>, vector<1x168x32xbf16>
    %6 = vector.shape_cast %5 : vector<1x168x32xbf16> to vector<168x32xbf16>
    %c1_7 = arith.constant 1 : index
    %c0_8 = arith.constant 0 : index
    %c0_9 = arith.constant 0 : index
    %7 = vector.load %arg3[%c1_7, %c0_8, %c0_9] : memref<9x32x64xbf16, #tpu.memory_space<vmem>>, vector<1x32x64xbf16>
    %8 = vector.shape_cast %7 : vector<1x32x64xbf16> to vector<32x64xbf16>
    %cst_10 = arith.constant dense<0.000000e+00> : vector<168x64xf32>
    %9 = tpu.matmul %6, %8, %cst_10 {dimension_numbers = #tpu.dot_dimension_numbers<[1], [0], [0], [1], [0, 0, 1, 1], [], []>} : vector<168x32xbf16>, vector<32x64xbf16>, vector<168x64xf32> -> vector<168x64xf32>
    %10 = arith.addf %4, %9 : vector<168x64xf32>
    %c0_11 = arith.constant 0 : index
    %c2 = arith.constant 2 : index
    %c0_12 = arith.constant 0 : index
    %11 = vector.load %arg2[%c0_11, %c2, %c0_12] : memref<1x210x32xbf16, #tpu.memory_space<vmem>>, vector<1x168x32xbf16>
    %12 = vector.shape_cast %11 : vector<1x168x32xbf16> to vector<168x32xbf16>
    %c2_13 = arith.constant 2 : index
    %c0_14 = arith.constant 0 : index
    %c0_15 = arith.constant 0 : index
    %13 = vector.load %arg3[%c2_13, %c0_14, %c0_15] : memref<9x32x64xbf16, #tpu.memory_space<vmem>>, vector<1x32x64xbf16>
    %14 = vector.shape_cast %13 : vector<1x32x64xbf16> to vector<32x64xbf16>
    %cst_16 = arith.constant dense<0.000000e+00> : vector<168x64xf32>
    %15 = tpu.matmul %12, %14, %cst_16 {dimension_numbers = #tpu.dot_dimension_numbers<[1], [0], [0], [1], [0, 0, 1, 1], [], []>} : vector<168x32xbf16>, vector<32x64xbf16>, vector<168x64xf32> -> vector<168x64xf32>
    %16 = arith.addf %10, %15 : vector<168x64xf32>
    %c0_17 = arith.constant 0 : index
    %c14 = arith.constant 14 : index
    %c0_18 = arith.constant 0 : index
    %17 = vector.load %arg2[%c0_17, %c14, %c0_18] : memref<1x210x32xbf16, #tpu.memory_space<vmem>>, vector<1x168x32xbf16>
    %18 = vector.shape_cast %17 : vector<1x168x32xbf16> to vector<168x32xbf16>
    %c3 = arith.constant 3 : index
    %c0_19 = arith.constant 0 : index
    %c0_20 = arith.constant 0 : index
    %19 = vector.load %arg3[%c3, %c0_19, %c0_20] : memref<9x32x64xbf16, #tpu.memory_space<vmem>>, vector<1x32x64xbf16>
    %20 = vector.shape_cast %19 : vector<1x32x64xbf16> to vector<32x64xbf16>
    %cst_21 = arith.constant dense<0.000000e+00> : vector<168x64xf32>
    %21 = tpu.matmul %18, %20, %cst_21 {dimension_numbers = #tpu.dot_dimension_numbers<[1], [0], [0], [1], [0, 0, 1, 1], [], []>} : vector<168x32xbf16>, vector<32x64xbf16>, vector<168x64xf32> -> vector<168x64xf32>
    %22 = arith.addf %16, %21 : vector<168x64xf32>
    %c0_22 = arith.constant 0 : index
    %c15 = arith.constant 15 : index
    %c0_23 = arith.constant 0 : index
    %23 = vector.load %arg2[%c0_22, %c15, %c0_23] : memref<1x210x32xbf16, #tpu.memory_space<vmem>>, vector<1x168x32xbf16>
    %24 = vector.shape_cast %23 : vector<1x168x32xbf16> to vector<168x32xbf16>
    %c4 = arith.constant 4 : index
    %c0_24 = arith.constant 0 : index
    %c0_25 = arith.constant 0 : index
    %25 = vector.load %arg3[%c4, %c0_24, %c0_25] : memref<9x32x64xbf16, #tpu.memory_space<vmem>>, vector<1x32x64xbf16>
    %26 = vector.shape_cast %25 : vector<1x32x64xbf16> to vector<32x64xbf16>
    %cst_26 = arith.constant dense<0.000000e+00> : vector<168x64xf32>
    %27 = tpu.matmul %24, %26, %cst_26 {dimension_numbers = #tpu.dot_dimension_numbers<[1], [0], [0], [1], [0, 0, 1, 1], [], []>} : vector<168x32xbf16>, vector<32x64xbf16>, vector<168x64xf32> -> vector<168x64xf32>
    %28 = arith.addf %22, %27 : vector<168x64xf32>
    %c0_27 = arith.constant 0 : index
    %c16 = arith.constant 16 : index
    %c0_28 = arith.constant 0 : index
    %29 = vector.load %arg2[%c0_27, %c16, %c0_28] : memref<1x210x32xbf16, #tpu.memory_space<vmem>>, vector<1x168x32xbf16>
    %30 = vector.shape_cast %29 : vector<1x168x32xbf16> to vector<168x32xbf16>
    %c5 = arith.constant 5 : index
    %c0_29 = arith.constant 0 : index
    %c0_30 = arith.constant 0 : index
    %31 = vector.load %arg3[%c5, %c0_29, %c0_30] : memref<9x32x64xbf16, #tpu.memory_space<vmem>>, vector<1x32x64xbf16>
    %32 = vector.shape_cast %31 : vector<1x32x64xbf16> to vector<32x64xbf16>
    %cst_31 = arith.constant dense<0.000000e+00> : vector<168x64xf32>
    %33 = tpu.matmul %30, %32, %cst_31 {dimension_numbers = #tpu.dot_dimension_numbers<[1], [0], [0], [1], [0, 0, 1, 1], [], []>} : vector<168x32xbf16>, vector<32x64xbf16>, vector<168x64xf32> -> vector<168x64xf32>
    %34 = arith.addf %28, %33 : vector<168x64xf32>
    %c0_32 = arith.constant 0 : index
    %c28 = arith.constant 28 : index
    %c0_33 = arith.constant 0 : index
    %35 = vector.load %arg2[%c0_32, %c28, %c0_33] : memref<1x210x32xbf16, #tpu.memory_space<vmem>>, vector<1x168x32xbf16>
    %36 = vector.shape_cast %35 : vector<1x168x32xbf16> to vector<168x32xbf16>
    %c6 = arith.constant 6 : index
    %c0_34 = arith.constant 0 : index
    %c0_35 = arith.constant 0 : index
    %37 = vector.load %arg3[%c6, %c0_34, %c0_35] : memref<9x32x64xbf16, #tpu.memory_space<vmem>>, vector<1x32x64xbf16>
    %38 = vector.shape_cast %37 : vector<1x32x64xbf16> to vector<32x64xbf16>
    %cst_36 = arith.constant dense<0.000000e+00> : vector<168x64xf32>
    %39 = tpu.matmul %36, %38, %cst_36 {dimension_numbers = #tpu.dot_dimension_numbers<[1], [0], [0], [1], [0, 0, 1, 1], [], []>} : vector<168x32xbf16>, vector<32x64xbf16>, vector<168x64xf32> -> vector<168x64xf32>
    %40 = arith.addf %34, %39 : vector<168x64xf32>
    %c0_37 = arith.constant 0 : index
    %c29 = arith.constant 29 : index
    %c0_38 = arith.constant 0 : index
    %41 = vector.load %arg2[%c0_37, %c29, %c0_38] : memref<1x210x32xbf16, #tpu.memory_space<vmem>>, vector<1x168x32xbf16>
    %42 = vector.shape_cast %41 : vector<1x168x32xbf16> to vector<168x32xbf16>
    %c7 = arith.constant 7 : index
    %c0_39 = arith.constant 0 : index
    %c0_40 = arith.constant 0 : index
    %43 = vector.load %arg3[%c7, %c0_39, %c0_40] : memref<9x32x64xbf16, #tpu.memory_space<vmem>>, vector<1x32x64xbf16>
    %44 = vector.shape_cast %43 : vector<1x32x64xbf16> to vector<32x64xbf16>
    %cst_41 = arith.constant dense<0.000000e+00> : vector<168x64xf32>
    %45 = tpu.matmul %42, %44, %cst_41 {dimension_numbers = #tpu.dot_dimension_numbers<[1], [0], [0], [1], [0, 0, 1, 1], [], []>} : vector<168x32xbf16>, vector<32x64xbf16>, vector<168x64xf32> -> vector<168x64xf32>
    %46 = arith.addf %40, %45 : vector<168x64xf32>
    %c0_42 = arith.constant 0 : index
    %c30 = arith.constant 30 : index
    %c0_43 = arith.constant 0 : index
    %47 = vector.load %arg2[%c0_42, %c30, %c0_43] : memref<1x210x32xbf16, #tpu.memory_space<vmem>>, vector<1x168x32xbf16>
    %48 = vector.shape_cast %47 : vector<1x168x32xbf16> to vector<168x32xbf16>
    %c8 = arith.constant 8 : index
    %c0_44 = arith.constant 0 : index
    %c0_45 = arith.constant 0 : index
    %49 = vector.load %arg3[%c8, %c0_44, %c0_45] : memref<9x32x64xbf16, #tpu.memory_space<vmem>>, vector<1x32x64xbf16>
    %50 = vector.shape_cast %49 : vector<1x32x64xbf16> to vector<32x64xbf16>
    %cst_46 = arith.constant dense<0.000000e+00> : vector<168x64xf32>
    %51 = tpu.matmul %48, %50, %cst_46 {dimension_numbers = #tpu.dot_dimension_numbers<[1], [0], [0], [1], [0, 0, 1, 1], [], []>} : vector<168x32xbf16>, vector<32x64xbf16>, vector<168x64xf32> -> vector<168x64xf32>
    %52 = arith.addf %46, %51 : vector<168x64xf32>
    %c0_47 = arith.constant 0 : index
    %c0_48 = arith.constant 0 : index
    %53 = vector.load %arg4[%c0_47, %c0_48] : memref<1x64xf32, #tpu.memory_space<vmem>>, vector<1x64xf32>
    %54 = vector.broadcast %53 : vector<1x64xf32> to vector<168x64xf32>
    %55 = arith.addf %52, %54 : vector<168x64xf32>
    %cst_49 = arith.constant 0.000000e+00 : f32
    %56 = vector.broadcast %cst_49 : f32 to vector<168x64xf32>
    %57 = arith.maximumf %55, %56 : vector<168x64xf32>
    %58 = arith.truncf %57 : vector<168x64xf32> to vector<168x64xbf16>
    %c0_50 = arith.constant 0 : index
    %c0_51 = arith.constant 0 : index
    %c0_52 = arith.constant 0 : index
    %59 = vector.load %arg5[%c0_50, %c0_51, %c0_52] : memref<1x168x64xbf16, #tpu.memory_space<vmem>>, vector<1x168x64xbf16>
    %60 = vector.shape_cast %59 : vector<1x168x64xbf16> to vector<168x64xbf16>
    %61 = vector.shape_cast %58 : vector<168x64xbf16> to vector<1x168x64xbf16>
    tpu.vector_store %arg5[%c0_50, %c0_51, %c0_52], %61 {strides = array<i32>} : memref<1x168x64xbf16, #tpu.memory_space<vmem>>, vector<1x168x64xbf16>,
    return
  }
  func.func @transform_0(%arg0: i32, %arg1: i32) -> (i32, i32, i32) {
    %c0_i32 = arith.constant 0 : i32
    %c0_i32_0 = arith.constant 0 : i32
    %c0_i32_1 = arith.constant 0 : i32
    return %arg1, %c0_i32, %c0_i32_0 : i32, i32, i32
  }
  func.func @transform_1(%arg0: i32, %arg1: i32) -> (i32, i32, i32) {
    %c0_i32 = arith.constant 0 : i32
    %c0_i32_0 = arith.constant 0 : i32
    %c0_i32_1 = arith.constant 0 : i32
    return %c0_i32, %c0_i32_0, %arg0 : i32, i32, i32
  }
  func.func @transform_2(%arg0: i32, %arg1: i32) -> (i32, i32) {
    %c0_i32 = arith.constant 0 : i32
    %c0_i32_0 = arith.constant 0 : i32
    return %c0_i32, %arg0 : i32, i32
  }
  func.func @transform_3(%arg0: i32, %arg1: i32) -> (i32, i32, i32) {
    %c0_i32 = arith.constant 0 : i32
    %c0_i32_0 = arith.constant 0 : i32
    return %arg1, %c0_i32, %arg0 : i32, i32, i32
  }
}

</mosaic_0001>

<bundles_post_ra>
// kernel: tpu_custom_call.1
= control target key start
LH: loop header
LB: loop body
LE: loop exit
PB: predicated region body
PF: predicated region fallthrough
CT: control target
= control target key end

     0   :  { %s3729_s12 = smov 0   ;;  %s3731_s13 = smov 0   ;;  %s4829_s0 = inlined_call_operand.vmem [shape: bf16[2,210,32], index: 0, kind: input, shape index: {}]   ;;  %s4830_s1 = inlined_call_operand.vmem [shape: bf16[9,32,64], index: 1, kind: input, shape index: {}]   ;;  %s4831_s2 = inlined_call_operand.vmem [shape: f32[1,64], index: 2, kind: input, shape index: {}]   ;;  %s4832_s3 = inlined_call_operand.vmem [shape: bf16[2,168,64], index: 3, kind: output, shape index: {}]  }
   0x1   :  { %s3733_s14 = smov 0  }
   0x2 LB: > { %s22_s15 = sadd.s32 1, %s3701_s13  ;;  %p2789_p0 = scmp.ge.s32.totalorder %s3705_s14, 1  ;;  %s3705_s14 = sphi %s3733_s14, %s13_s14   ;;  %s3701_s13 = sphi %s3731_s13, %s4834_s13   ;;  %s3697_s12 = sphi %s3729_s12, %s4833_s12  }
   0x3   : > { %p23_p1 = scmp.ge.s32.totalorder %s22_s15, 2  ;;  %p168_p2 = scmp.lt.s32.totalorder %s3705_s14, 3 }
   0x5   : > { %s4836_s15 = smov (%p23_p1, %s22_s15), 0  ;;  %p169_p3 = pnand %p2789_p0, %p168_p2 }
   0x6   : > { %v3616_v0 = vld [vmem:[%s4830_s1 + $0x10] sm:$0xff] (!%p169_p3)   ;;  %v3707_v1 = vmov (!%p169_p3), 0.0   ;;  %v3617_v2 = vld [vmem:[%s4830_s1 + $0x18] sm:$0xff] (!%p169_p3)   ;;  %p202_p4 = scmp.lt.s32.totalorder (!%p169_p3), %s3697_s12, 1  ;;  %vm3708_vm0 = vmmov (!%p169_p3), 0   ;;  %vm409_vm2 = vcmask (!%p169_p3), 261120  }
   0x7   : > { %172 = sbr.rel (%p169_p3) target bundleno = 641 (0x281), region = 32  ;;  %3152 = vmatprep.subr.bf16.mxu0 (!%p169_p3), %v3707_v1  ;;  %3584 = vmatprep.subr.bf16.mxu1 (!%p169_p3), %v3707_v1  ;;  %vm309_vm1 = vsmask.f32 (!%p169_p3), 7424  ;;  %v3622_v19 = vld [vmem:[%s4830_s1 + $0x20] sm:$0xff] (!%p169_p3)   ;;  %v3630_v34 = vld [vmem:[%s4830_s1 + $0x28] sm:$0xff] (!%p169_p3)   ;;  %vm728_vm3 = vcmask (!%p169_p3), 1046528  }
   0x8   : > { %3153 = vmatpush3.bf16.msra.mxu0 (!%p169_p3), %v3616_v0  ;;  %3586 = vmatpush3.bf16.msra.mxu1 (!%p169_p3), %v3616_v0  ;;  %v3623_v27 = vld [vmem:[%s4830_s1] sm:$0xff] (!%p169_p3)   ;;  %v3631_v38 = vld [vmem:[%s4830_s1 + $0x8] sm:$0xff] (!%p169_p3)   ;;  %vm1018_vm4 = vcmask (!%p169_p3), 1044480   ;;  %vm1235_vm5 = vsmask.f32 (!%p169_p3), 4352  ;;  %vm1804_vm6 = vcmask (!%p169_p3), 1045504  }
   0x9   : > { %3154 = vmatprep.subr.bf16.mxu0 (!%p169_p3), %v3707_v1  ;;  %3585 = vmatprep.subr.bf16.mxu1 (!%p169_p3), %v3707_v1  ;;  %vm2021_vm7 = vsmask.f32 (!%p169_p3), 5376  ;;  %vm2656_vm8 = vcmask (!%p169_p3), 519168  }
   0xa   : > { %3156 = vmatprep.mubr.msk.bf16.mxu0 (!%p169_p3), %vm3708_vm0, %v3707_v1  ;;  %3180 = vmatprep.mubr.msk.bf16.mxu1 (!%p169_p3), %vm3708_vm0, %v3707_v1 }
   0xc   : > { %3155 = vmatpush3.bf16.msra.mxu0 (!%p169_p3), %v3617_v2  ;;  %3587 = vmatpush3.bf16.msra.mxu1 (!%p169_p3), %v3617_v2 }
   0xd   : > { %3248 = vmatprep.subr.bf16.mxu0 (!%p169_p3), %v3707_v1  ;;  %3200 = vmatprep.subr.bf16.mxu1 (!%p169_p3), %v3707_v1 }
   0xe   : > { %s4838_s12 = smov (!%p202_p4, %s3697_s12), 1 }
   0xf   : > { %s3588_s20 = smul.u32 108, %s4838_s12 }
  0x10   : > { %s3589_s8 = smul.u32 84, %s4838_s12 }
  0x11   : > { %s3769_s23 = scalar_lea.vmem %s4829_s0, %s3588_s20 }
  0x12   : > { %v223_v3 = vld [vmem:[%s3769_s23] sm:$0xf]  ;;  %v3773_v4 = vld [vmem:[%s3769_s23 + $0x4] sm:$0xf]  ;;  %v3779_v6 = vld [vmem:[%s3769_s23 + $0x8] sm:$0xff]   ;;  %s4740_s11 = scalar_lea.vmem %s4832_s3, %s3589_s8 }
  0x13   : > { %v3776_v5 = vcombine.low %v223_v3, %v3773_v4  ;;  %v318_v9 = vshll.u32 %v3779_v6, 16  ;;  %v3785_v10 = vld [vmem:[%s3769_s23 + $0x30] sm:$0xff]   ;;  %v3788_v11 = vld [vmem:[%s3769_s23 + $0x38] sm:$0xff]   ;;  %v3794_v13 = vld [vmem:[%s3769_s23 + $0x40] sm:$0xff]   ;;  %v322_v20 = vshrl.u32 %v3779_v6, 16 }
  0x14   : > { %v3791_v12 = vld [vmem:[%s3769_s23 + $0x10] sm:$0xff]   ;;  %v358_v16 = vshll.u32 %v3785_v10, 16  ;;  %v362_v17 = vshrl.u32 %v3785_v10, 16  ;;  %v366_v18 = vshll.u32 %v3788_v11, 16  ;;  %v370_v28 = vshrl.u32 %v3788_v11, 16  ;;  %v3818_v33 = vld [vmem:[%s3769_s23 + $0x18] sm:$0xff]  }
  0x15   : > { %v311_v7 = vshrl.u32 %v3776_v5, 16  ;;  %v313_v8 = vshll.u32 %v3776_v5, 16  ;;  %v320_v15 = vrot.slane %v318_v9, 1  ;;  %v326_v23 = vshll.u32 %v3791_v12, 16  ;;  %v3828_v37 = vld [vmem:[%s3769_s23 + $0x48] sm:$0xff]   ;;  %v3847_v47 = vld [vmem:[%s3769_s23 + $0x20] sm:$0xff]  }
  0x16   : > { %v3803_v22 = vrot.slane %v358_v16, 1  ;;  %v368_v24 = vrot.slane %v366_v18, 1  ;;  %v374_v29 = vshll.u32 %v3794_v13, 16  ;;  %v330_v40 = vshrl.u32 %v3791_v12, 16  ;;  %v3842_v45 = vld [vmem:[%s3769_s23 + $0x50] sm:$0xf] }
  0x17   : > { %v315_v14 = vrot.slane %v313_v8, 1  ;;  %v324_v31 = vor.u32 %v322_v20, %v320_v15  ;;  %v328_v32 = vrot.slane %v326_v23, 1  ;;  %v334_v41 = vshll.u32 %v3818_v33, 16  ;;  %v248_v46 = vld [vmem:[%s3769_s23 + $0x54] sm:$0x1]  ;;  %v3874_v62 = vld [vmem:[%s3769_s23 + $0x28] sm:$0xff]  }
  0x18   : > { %v364_v26 = vor.u32 %v362_v17, %v3803_v22  ;;  %v372_v35 = vor.u32 %v370_v28, %v368_v24  ;;  %v376_v36 = vrot.slane %v374_v29, 1  ;;  %v378_v43 = vshrl.u32 %v3794_v13, 16  ;;  %v719_v23 = vld [vmem:[%s3769_s23] sm:$0xe] }
  0x19   : > { %v316_v21 = vor.u32 %v315_v14, %v311_v7  ;;  %v329_v39 = vsel %vm309_vm1, %v324_v31, %v328_v32  ;;  %v382_v44 = vshll.u32 %v3828_v37, 16  ;;  %v332_v48 = vor.u32 %v330_v40, %v328_v32  ;;  %v3635_v29 = vld [vmem:[%s4830_s1 + $0x40] sm:$0xff]  }
  0x1a   : > { %v369_v30 = vsel %vm309_vm1, %v364_v26, %v368_v24  ;;  %v377_v42 = vsel %vm309_vm1, %v372_v35, %v376_v36  ;;  %v336_v49 = vrot.slane %v334_v41, 1  ;;  %v3854_v50 = vcombine.low %v3842_v45, %v248_v46  ;;  %v3633_v26 = vld [vmem:[%s4830_s1 + $0x30] sm:$0xff]  }
  0x1b   : > { %v321_v25 = vsel %vm309_vm1, %v316_v21, %v320_v15  ;;  %3181 = vmatmul.mubr.msk.bf16.vlgmr.msra.gmra.mrb[0].mxu1 %vm409_vm2, %v369_v30  ;;  %v380_v51 = vor.u32 %v378_v43, %v376_v36  ;;  %v384_v52 = vrot.slane %v382_v44, 1  ;;  %v338_v53 = vshrl.u32 %v3818_v33, 16  ;;  %v3637_v30 = vld [vmem:[%s4830_s1 + $0x48] sm:$0xff]   ;;  %v4018_v44 = vld [vmem:[%s3769_s23 + $0x10] sm:$0xf] }
  0x1c   : > { %3157 = vmatmul.mubr.msk.bf16.vlgmr.msra.gmra.mrb[0].mxu0 %vm409_vm2, %v321_v25  ;;  %3201 = vmatpush3.bf16.msra.mxu1 %v3623_v27  ;;  %v342_v54 = vshll.u32 %v3847_v47, 16  ;;  %v746_v55 = vrot.slane %v3828_v37, 1  ;;  %v748_v56 = vrot.slane %v3854_v50, 1  ;;  %v337_v57 = vsel %vm309_vm1, %v332_v48, %v336_v49  ;;  %v4015_v43 = vld [vmem:[%s3769_s23 + $0xc] sm:$0xf] }
  0x1d   : > { %3249 = vmatpush3.bf16.msra.mxu0 %v3622_v19  ;;  %3160 = vmatprep.mubr.msk.bf16.mxu0 %vm3708_vm0, %v3707_v1  ;;  %v385_v59 = vsel %vm309_vm1, %v380_v51, %v384_v52  ;;  %v386_v60 = vshrl.u32 %v3828_v37, 16  ;;  %v390_v61 = vshll.u32 %v3854_v50, 16  ;;  %v340_v63 = vor.u32 %v338_v53, %v336_v49 }
  0x1e   : > { %3250 = vmatprep.subr.bf16.mxu0 %v3707_v1  ;;  %3184 = vmatprep.mubr.msk.bf16.mxu1 %vm3708_vm0, %v3707_v1  ;;  %v3868_v58 = vsel %vm728_vm3, %v746_v55, %v748_v56  ;;  %v344_v0 = vrot.slane %v342_v54, 1  ;;  %v350_v7 = vshll.u32 %v3874_v62, 16  ;;  %v346_v9 = vshrl.u32 %v3847_v47, 16  ;;  %v4033_v54 = vld [vmem:[%s3769_s23 + $0x14] sm:$0xf] }
  0x1f   : > { %3202 = vmatprep.subr.bf16.mxu1 %v3707_v1  ;;  %v388_v2 = vor.u32 %v386_v60, %v384_v52  ;;  %v392_v3 = vrot.slane %v390_v61, 1  ;;  %v394_v16 = vshrl.u32 %v3854_v50, 16  ;;  %v354_v19 = vshrl.u32 %v3874_v62, 16  ;;  %v3649_v50 = vld [vmem:[%s4830_s1 + $0x58] sm:$0xff]  }
  0x20   : > { %3203 = vmatpush3.bf16.msra.mxu1 %v3631_v38  ;;  %v345_v8 = vsel %vm309_vm1, %v340_v63, %v344_v0  ;;  %v352_v15 = vrot.slane %v350_v7, 1  ;;  %v348_v17 = vor.u32 %v346_v9, %v344_v0  ;;  %v2838_v25 = vcombine.low %v719_v23, %v3773_v4  ;;  %v3636_v4 = vld [vmem:[%s4830_s1 + $0x38] sm:$0xff]   ;;  %v4059_v9 = vld [vmem:[%s3769_s23 + $0x20] sm:$0xf] }
  0x21   : > { %3251 = vmatpush3.bf16.msra.mxu0 %v3630_v34  ;;  %3296 = vmatprep.subr.bf16.mxu1 %v3707_v1  ;;  %v393_v14 = vsel %vm309_vm1, %v388_v2, %v392_v3  ;;  %v396_v20 = vor.u32 %v394_v16, %v392_v3  ;;  %v730_v28 = vrot.slane %v3779_v6, 1  ;;  %v734_v32 = vrot.slane %v3818_v33, 1 }
  0x22   : > { %3344 = vmatprep.subr.bf16.mxu0 %v3707_v1  ;;  %v353_v18 = vsel %vm309_vm1, %v348_v17, %v352_v15  ;;  %v356_v21 = vor.u32 %v354_v19, %v352_v15  ;;  %v729_v27 = vrot.slane %v2838_v25, 1  ;;  %v736_v34 = vrot.slane %v3847_v47, 1  ;;  %v3643_v15 = vld [vmem:[%s4830_s1 + $0x60] sm:$0xff]  }
  0x23   : > { %3185 = vmatmul.mubr.msk.bf16.gmra.mrb[4].mxu1 %vm409_vm2, %v377_v42  ;;  %v738_v35 = vrot.slane %v3874_v62, 1  ;;  %v740_v36 = vrot.slane %v3785_v10, 1  ;;  %v744_v41 = vrot.slane %v3794_v13, 1  ;;  %v936_v42 = vld [vmem:[%s3769_s23 + $0x4] sm:$0x8]  ;;  %v2820_v46 = vcombine.low %v3842_v45, %v3842_v45 }
  0x24   : > { %3161 = vmatmul.mubr.msk.bf16.gmra.mrb[4].mxu0 %vm409_vm2, %v329_v39  ;;  %3188 = vmatprep.mubr.msk.bf16.mxu1 %vm3708_vm0, %v3707_v1  ;;  %v361_v24 = vsel %vm309_vm1, %v356_v21, %v3803_v22  ;;  %v731_v22 = vsel %vm728_vm3, %v729_v27, %v730_v28  ;;  %v742_v39 = vrot.slane %v3788_v11, 1  ;;  %v4084_v27 = vld [vmem:[%s3769_s23 + $0x28] sm:$0xf] }
  0x25   : > { %3164 = vmatprep.mubr.msk.bf16.mxu0 %vm3708_vm0, %v3707_v1  ;;  %v741_v38 = vsel %vm728_vm3, %v738_v35, %v740_v36 }
  0x26   : > { %v743_v40 = vsel %vm728_vm3, %v740_v36, %v742_v39 }
  0x2b   : > { %3189 = vmatmul.mubr.msk.bf16.gmra.mrb[8].mxu1 %vm409_vm2, %v385_v59 }
  0x2c   : > { %3165 = vmatmul.mubr.msk.bf16.gmra.mrb[8].mxu0 %vm409_vm2, %v337_v57  ;;  %3192 = vmatprep.mubr.msk.bf16.mxu1 %vm3708_vm0, %v3707_v1 }
  0x2d   : > { %3168 = vmatprep.mubr.msk.bf16.mxu0 %vm3708_vm0, %v3707_v1 }
  0x33   : > { %3193 = vmatmul.mubr.msk.bf16.gmra.mrb[12].mxu1 %vm409_vm2, %v393_v14 }
  0x34   : > { %3169 = vmatmul.mubr.msk.bf16.gmra.mrb[12].mxu0 %vm409_vm2, %v345_v8  ;;  %3196 = vmatprep.mubr.msk.bf16.mxu1 %vm3708_vm0, %v3707_v1 }
  0x35   : > { %3172 = vmatprep.mubr.msk.bf16.mxu0 %vm3708_vm0, %v3707_v1 }
  0x3b   : > { %3197 = vmatmul.mubr.msk.bf16.gmra.mrb[16].mxu1 %vm409_vm2, %v396_v20 }
  0x3c   : > { %3173 = vmatmul.mubr.msk.bf16.gmra.mrb[16].mxu0 %vm409_vm2, %v353_v18  ;;  %3204 = vmatprep.mubr.msk.bf16.mxu1 %vm3708_vm0, %v3707_v1 }
  0x3d   : > { %3176 = vmatprep.mubr.msk.bf16.mxu0 %vm3708_vm0, %v3707_v1 }
  0x43   : > { %3205 = vmatmul.mubr.msk.bf16.vlgmr.msra.gmra.mrb[20].mxu1 %vm409_vm2, %v3776_v5  ;;  %v732_v5 = vrot.slane %v3791_v12, 1 }
  0x44   : > { %3177 = vmatmul.mubr.msk.bf16.gmra.mrb[20].mxu0 %vm409_vm2, %v361_v24  ;;  %3297 = vmatpush3.bf16.msra.mxu1 %v3633_v26  ;;  %v3650_v24 = vld [vmem:[%s4830_s1 + $0x68] sm:$0xff]   ;;  %v4081_v26 = vld [vmem:[%s3769_s23 + $0x24] sm:$0xf] }
  0x45   : > { %3252 = vmatprep.mubr.msk.bf16.mxu0 %vm3708_vm0, %v3707_v1  ;;  %3208 = vmatprep.mubr.msk.bf16.mxu1 %vm3708_vm0, %v3707_v1  ;;  %v733_v31 = vsel %vm728_vm3, %v730_v28, %v732_v5 }
  0x46   : > { %3298 = vmatprep.subr.bf16.mxu1 %v3707_v1 }
  0x48   : > { %3299 = vmatpush3.bf16.msra.mxu1 %v3636_v4 }
  0x49   : > { %3392 = vmatprep.subr.bf16.mxu1 %v3707_v1 }
  0x4b   : > { %3209 = vmatmul.mubr.msk.bf16.gmra.mrb[24].mxu1 %vm409_vm2, %v3779_v6  ;;  %v735_v6 = vsel %vm728_vm3, %v732_v5, %v734_v32  ;;  %v2860_v5 = vcombine.low %v4081_v26, %v4084_v27 }
  0x4c   : > { %3253 = vmatmul.mubr.msk.bf16.vlgmr.msra.gmra.mrb[24].mxu0 %vm409_vm2, %v731_v22  ;;  %3212 = vmatprep.mubr.msk.bf16.mxu1 %vm3708_vm0, %v3707_v1 }
  0x4d   : > { %3345 = vmatpush3.bf16.msra.mxu0 %v3635_v29  ;;  %3256 = vmatprep.mubr.msk.bf16.mxu0 %vm3708_vm0, %v3707_v1 }
  0x4e   : > { %3346 = vmatprep.subr.bf16.mxu0 %v3707_v1 }
  0x51   : > { %3347 = vmatpush3.bf16.msra.mxu0 %v3637_v30 }
  0x52   : > { %3440 = vmatprep.subr.bf16.mxu0 %v3707_v1 }
  0x53   : > { %3213 = vmatmul.mubr.msk.bf16.gmra.mrb[28].mxu1 %vm409_vm2, %v3791_v12  ;;  %v737_v12 = vsel %vm728_vm3, %v734_v32, %v736_v34  ;;  %v1275_v32 = vshll.u32 %v2860_v5, 16 }
  0x54   : > { %3257 = vmatmul.mubr.msk.bf16.gmra.mrb[28].mxu0 %vm409_vm2, %v733_v31  ;;  %3216 = vmatprep.mubr.msk.bf16.mxu1 %vm3708_vm0, %v3707_v1  ;;  %v1272_v31 = vshrl.u32 %v2860_v5, 16 }
  0x55   : > { %3260 = vmatprep.mubr.msk.bf16.mxu0 %vm3708_vm0, %v3707_v1  ;;  %v1277_v36 = vrot.slane %v1275_v32, 4 }
  0x5b   : > { %3217 = vmatmul.mubr.msk.bf16.gmra.mrb[32].mxu1 %vm409_vm2, %v3818_v33  ;;  %v739_v33 = vsel %vm728_vm3, %v736_v34, %v738_v35  ;;  %v4098_v34 = vld [vmem:[%s3769_s23 + $0x2c] sm:$0xf] }
  0x5c   : > { %3261 = vmatmul.mubr.msk.bf16.gmra.mrb[32].mxu0 %vm409_vm2, %v735_v6  ;;  %3220 = vmatprep.mubr.msk.bf16.mxu1 %vm3708_vm0, %v3707_v1  ;;  %v1026_v6 = vrot.slane %v2860_v5, 3 }
  0x5d   : > { %3264 = vmatprep.mubr.msk.bf16.mxu0 %vm3708_vm0, %v3707_v1 }
  0x63   : > { %3221 = vmatmul.mubr.msk.bf16.gmra.mrb[36].mxu1 %vm409_vm2, %v3847_v47 }
  0x64   : > { %3265 = vmatmul.mubr.msk.bf16.gmra.mrb[36].mxu0 %vm409_vm2, %v737_v12  ;;  %3224 = vmatprep.mubr.msk.bf16.mxu1 %vm3708_vm0, %v3707_v1  ;;  %v4101_v12 = vld [vmem:[%s3769_s23 + $0x30] sm:$0xf] }
  0x65   : > { %3268 = vmatprep.mubr.msk.bf16.mxu0 %vm3708_vm0, %v3707_v1 }
  0x6b   : > { %3225 = vmatmul.mubr.msk.bf16.gmra.mrb[40].mxu1 %vm409_vm2, %v3874_v62  ;;  %v3641_v62 = vld [vmem:[%s4830_s1 + $0x50] sm:$0xff]  }
  0x6c   : > { %3269 = vmatmul.mubr.msk.bf16.gmra.mrb[40].mxu0 %vm409_vm2, %v739_v33  ;;  %3228 = vmatprep.mubr.msk.bf16.mxu1 %vm3708_vm0, %v3707_v1  ;;  %v1274_v33 = vrot.slane %v1272_v31, 3 }
  0x6d   : > { %3272 = vmatprep.mubr.msk.bf16.mxu0 %vm3708_vm0, %v3707_v1 }
  0x73   : > { %3229 = vmatmul.mubr.msk.bf16.gmra.mrb[44].mxu1 %vm409_vm2, %v3785_v10  ;;  %v745_v10 = vsel %vm728_vm3, %v742_v39, %v744_v41  ;;  %v2861_v39 = vcombine.low %v4098_v34, %v4101_v12 }
  0x74   : > { %3273 = vmatmul.mubr.msk.bf16.gmra.mrb[44].mxu0 %vm409_vm2, %v741_v38  ;;  %3232 = vmatprep.mubr.msk.bf16.mxu1 %vm3708_vm0, %v3707_v1 }
  0x75   : > { %3276 = vmatprep.mubr.msk.bf16.mxu0 %vm3708_vm0, %v3707_v1 }
  0x7b   : > { %3233 = vmatmul.mubr.msk.bf16.gmra.mrb[48].mxu1 %vm409_vm2, %v3788_v11  ;;  %v747_v11 = vsel %vm728_vm3, %v744_v41, %v746_v55  ;;  %v4036_v55 = vld [vmem:[%s3769_s23 + $0x18] sm:$0xf]  ;;  %v1281_v41 = vshrl.u32 %v2861_v39, 16 }
  0x7c   : > { %3277 = vmatmul.mubr.msk.bf16.gmra.mrb[48].mxu0 %vm409_vm2, %v743_v40  ;;  %3236 = vmatprep.mubr.msk.bf16.mxu1 %vm3708_vm0, %v3707_v1  ;;  %v2858_v63 = vcombine.low %v4033_v54, %v4036_v55  ;;  %v1278_v40 = vor.u32 %v1277_v36, %v1274_v33  ;;  %v4181_v36 = vld [vmem:[%s3769_s23 + $0x54] sm:$0xf] }
  0x7d   : > { %3280 = vmatprep.mubr.msk.bf16.mxu0 %vm3708_vm0, %v3707_v1 }
  0x7e   : > { %v1254_v3 = vshrl.u32 %v2858_v63, 16  ;;  %v1257_v7 = vshll.u32 %v2858_v63, 16  ;;  %v1022_v8 = vrot.slane %v2858_v63, 3 }
  0x80   : > { %v1256_v16 = vrot.slane %v1254_v3, 3  ;;  %v1259_v17 = vrot.slane %v1257_v7, 4 }
  0x82   : > { %v1260_v20 = vor.u32 %v1259_v17, %v1256_v16 }
  0x83   : > { %3237 = vmatmul.mubr.msk.bf16.gmra.mrb[52].mxu1 %vm409_vm2, %v3794_v13  ;;  %v4012_v13 = vld [vmem:[%s3769_s23 + $0x8] sm:$0xf] }
  0x84   : > { %3281 = vmatmul.mubr.msk.bf16.gmra.mrb[52].mxu0 %vm409_vm2, %v745_v10  ;;  %3240 = vmatprep.mubr.msk.bf16.mxu1 %vm3708_vm0, %v3707_v1  ;;  %v2856_v47 = vcombine.low %v936_v42, %v4012_v13  ;;  %v1284_v10 = vshll.u32 %v2861_v39, 16  ;;  %v4114_v42 = vld [vmem:[%s3769_s23 + $0x34] sm:$0xf] }
  0x85   : > { %3284 = vmatprep.mubr.msk.bf16.mxu0 %vm3708_vm0, %v3707_v1 }
  0x86   : > { %v1237_v48 = vshrl.u32 %v2856_v47, 16  ;;  %v1240_v49 = vshll.u32 %v2856_v47, 16  ;;  %v1019_v45 = vrot.slane %v2856_v47, 3 }
  0x88   : > { %v1239_v57 = vrot.slane %v1237_v48, 3  ;;  %v1286_v48 = vrot.slane %v1284_v10, 4 }
  0x8b   : > { %3241 = vmatmul.mubr.msk.bf16.gmra.mrb[56].mxu1 %vm409_vm2, %v3828_v37  ;;  %v2857_v37 = vcombine.low %v4015_v43, %v4018_v44 }
  0x8c   : > { %3285 = vmatmul.mubr.msk.bf16.gmra.mrb[56].mxu0 %vm409_vm2, %v747_v11  ;;  %3244 = vmatprep.mubr.msk.bf16.mxu1 %vm3708_vm0, %v3707_v1  ;;  %v1028_v11 = vrot.slane %v2861_v39, 3 }
  0x8d   : > { %3288 = vmatprep.mubr.msk.bf16.mxu0 %vm3708_vm0, %v3707_v1  ;;  %v1245_v51 = vshrl.u32 %v2857_v37, 16  ;;  %v1248_v52 = vshll.u32 %v2857_v37, 16  ;;  %v1020_v53 = vrot.slane %v2857_v37, 3  ;;  %v1283_v37 = vrot.slane %v1281_v41, 3 }
  0x8f   : > { %v1247_v59 = vrot.slane %v1245_v51, 3  ;;  %v1250_v60 = vrot.slane %v1248_v52, 4  ;;  %v1021_v61 = vsel %vm1018_vm4, %v1019_v45, %v1020_v53  ;;  %v1023_v18 = vsel %vm1018_vm4, %v1020_v53, %v1022_v8 }
  0x90   : > { %v1287_v52 = vor.u32 %v1286_v48, %v1283_v37 }
  0x91   : > { %v1251_v2 = vor.u32 %v1250_v60, %v1247_v59  ;;  %v4133_v59 = vld [vmem:[%s3769_s23 + $0x40] sm:$0xf] }
  0x92   : > { %v1288_v60 = vsel %vm1235_vm5, %v1278_v40, %v1287_v52 }
  0x93   : > { %3245 = vmatmul.mubr.msk.bf16.gmra.mrb[60].mxu1 %vm409_vm2, %v2820_v46  ;;  %v1261_v28 = vsel %vm1235_vm5, %v1251_v2, %v1260_v20  ;;  %v4117_v46 = vld [vmem:[%s3769_s23 + $0x38] sm:$0xf] }
  0x94   : > { %3289 = vmatmul.mubr.msk.bf16.gmra.mrb[60].mxu0 %vm409_vm2, %v3868_v58  ;;  %3300 = vmatprep.mubr.msk.bf16.mxu1 %vm3708_vm0, %v3707_v1  ;;  %v1242_v58 = vrot.slane %v1240_v49, 4  ;;  %v1029_v49 = vsel %vm1018_vm4, %v1026_v6, %v1028_v11  ;;  %v2862_v51 = vcombine.low %v4114_v42, %v4117_v46 }
  0x95   : > { %3292 = vmatprep.mubr.msk.bf16.mxu0 %vm3708_vm0, %v3707_v1 }
  0x96   : > { %v1243_v0 = vor.u32 %v1242_v58, %v1239_v57  ;;  %v1290_v45 = vshrl.u32 %v2862_v51, 16  ;;  %v1293_v53 = vshll.u32 %v2862_v51, 16  ;;  %v1030_v57 = vrot.slane %v2862_v51, 3  ;;  %v4130_v58 = vld [vmem:[%s3769_s23 + $0x3c] sm:$0xf] }
  0x98   : > { %v1252_v14 = vsel %vm1235_vm5, %v1243_v0, %v1251_v2  ;;  %v1031_v63 = vsel %vm1018_vm4, %v1028_v11, %v1030_v57  ;;  %v2863_v0 = vcombine.low %v4130_v58, %v4133_v59 }
  0x9a   : > { %v1299_v3 = vshrl.u32 %v2863_v0, 16  ;;  %v1302_v7 = vshll.u32 %v2863_v0, 16 }
  0x9b   : > { %3301 = vmatmul.mubr.msk.bf16.vlgmr.msra.gmra.mrb[64].mxu1 %vm409_vm2, %v1021_v61  ;;  %v1292_v61 = vrot.slane %v1290_v45, 3 }
  0x9c   : > { %3293 = vmatmul.mubr.msk.bf16.gmra.mrb[64].mxu0 %vm409_vm2, %v748_v56  ;;  %3393 = vmatpush3.bf16.msra.mxu1 %v3641_v62  ;;  %v4056_v56 = vld [vmem:[%s3769_s23 + $0x1c] sm:$0xf]  ;;  %v1295_v62 = vrot.slane %v1293_v53, 4  ;;  %v1301_v16 = vrot.slane %v1299_v3, 3  ;;  %v1304_v17 = vrot.slane %v1302_v7, 4 }
  0x9d   : > { %3348 = vmatprep.mubr.msk.bf16.mxu0 %vm3708_vm0, %v3707_v1  ;;  %3304 = vmatprep.mubr.msk.bf16.mxu1 %vm3708_vm0, %v3707_v1  ;;  %v2859_v19 = vcombine.low %v4056_v56, %v4059_v9 }
  0x9e   : > { %3394 = vmatprep.subr.bf16.mxu1 %v3707_v1  ;;  %v1296_v2 = vor.u32 %v1295_v62, %v1292_v61  ;;  %v1722_v62 = vld [vmem:[%s3769_s23 + $0xc] sm:$0xc] }
  0x9f   : > { %v1263_v21 = vshrl.u32 %v2859_v19, 16  ;;  %v1266_v23 = vshll.u32 %v2859_v19, 16  ;;  %v1024_v25 = vrot.slane %v2859_v19, 3 }
  0xa0   : > { %3395 = vmatpush3.bf16.msra.mxu1 %v3649_v50  ;;  %v4146_v50 = vld [vmem:[%s3769_s23 + $0x44] sm:$0xf] }
  0xa1   : > { %3488 = vmatprep.subr.bf16.mxu1 %v3707_v1  ;;  %v1265_v4 = vrot.slane %v1263_v21, 3  ;;  %v1268_v22 = vrot.slane %v1266_v23, 4  ;;  %v1025_v29 = vsel %vm1018_vm4, %v1022_v8, %v1024_v25  ;;  %v1027_v38 = vsel %vm1018_vm4, %v1024_v25, %v1026_v6  ;;  %v4162_v25 = vld [vmem:[%s3769_s23 + $0x4c] sm:$0xf] }
  0xa2   : > { %v1032_v8 = vrot.slane %v2863_v0, 3 }
  0xa3   : > { %3305 = vmatmul.mubr.msk.bf16.gmra.mrb[68].mxu1 %vm409_vm2, %v1023_v18  ;;  %v1269_v30 = vor.u32 %v1268_v22, %v1265_v4 }
  0xa4   : > { %3349 = vmatmul.mubr.msk.bf16.vlgmr.msra.gmra.mrb[68].mxu0 %vm409_vm2, %v1252_v14  ;;  %3308 = vmatprep.mubr.msk.bf16.mxu1 %vm3708_vm0, %v3707_v1  ;;  %v4149_v14 = vld [vmem:[%s3769_s23 + $0x48] sm:$0xf]  ;;  %v1033_v18 = vsel %vm1018_vm4, %v1030_v57, %v1032_v8 }
  0xa5   : > { %3441 = vmatpush3.bf16.msra.mxu0 %v3643_v15  ;;  %3352 = vmatprep.mubr.msk.bf16.mxu0 %vm3708_vm0, %v3707_v1  ;;  %v1270_v35 = vsel %vm1235_vm5, %v1260_v20, %v1269_v30  ;;  %v1279_v47 = vsel %vm1235_vm5, %v1269_v30, %v1278_v40  ;;  %v1297_v15 = vsel %vm1235_vm5, %v1287_v52, %v1296_v2 }
  0xa6   : > { %3442 = vmatprep.subr.bf16.mxu0 %v3707_v1  ;;  %v2864_v19 = vcombine.low %v4146_v50, %v4149_v14  ;;  %v1305_v20 = vor.u32 %v1304_v17, %v1301_v16 }
  0xa8   : > { %v1308_v21 = vshrl.u32 %v2864_v19, 16  ;;  %v1311_v23 = vshll.u32 %v2864_v19, 16  ;;  %v1306_v4 = vsel %vm1235_vm5, %v1296_v2, %v1305_v20 }
  0xa9   : > { %3443 = vmatpush3.bf16.msra.mxu0 %v3650_v24  ;;  %v1034_v24 = vrot.slane %v2864_v19, 3 }
  0xaa   : > { %3536 = vmatprep.subr.bf16.mxu0 %v3707_v1  ;;  %v1310_v22 = vrot.slane %v1308_v21, 3 }
  0xab   : > { %3309 = vmatmul.mubr.msk.bf16.gmra.mrb[72].mxu1 %vm409_vm2, %v1025_v29  ;;  %v1313_v29 = vrot.slane %v1311_v23, 4  ;;  %v1035_v5 = vsel %vm1018_vm4, %v1032_v8, %v1034_v24 }
  0xac   : > { %3353 = vmatmul.mubr.msk.bf16.gmra.mrb[72].mxu0 %vm409_vm2, %v1261_v28  ;;  %3312 = vmatprep.mubr.msk.bf16.mxu1 %vm3708_vm0, %v3707_v1  ;;  %v4165_v28 = vld [vmem:[%s3769_s23 + $0x50] sm:$0xf] }
  0xad   : > { %3356 = vmatprep.mubr.msk.bf16.mxu0 %vm3708_vm0, %v3707_v1  ;;  %v2865_v30 = vcombine.low %v4162_v25, %v4165_v28  ;;  %v1314_v31 = vor.u32 %v1313_v29, %v1310_v22 }
  0xaf   : > { %v1317_v32 = vshrl.u32 %v2865_v30, 16  ;;  %v1320_v6 = vshll.u32 %v2865_v30, 16  ;;  %v1036_v33 = vrot.slane %v2865_v30, 3  ;;  %v1315_v39 = vsel %vm1235_vm5, %v1305_v20, %v1314_v31  ;;  %v3656_v20 = vld [vmem:[%s4830_s1 + $0x70] sm:$0xff]   ;;  %v3660_v30 = vld [vmem:[%s4830_s1 + $0x80] sm:$0xff]  }
  0xb1   : > { %v1319_v40 = vrot.slane %v1317_v32, 3  ;;  %v1322_v41 = vrot.slane %v1320_v6, 4  ;;  %v1037_v11 = vsel %vm1018_vm4, %v1034_v24, %v1036_v33 }
  0xb3   : > { %3313 = vmatmul.mubr.msk.bf16.gmra.mrb[76].mxu1 %vm409_vm2, %v1027_v38  ;;  %v957_v38 = vld [vmem:[%s3769_s23 + $0x58] sm:$0x7]  ;;  %v1323_v37 = vor.u32 %v1322_v41, %v1319_v40  ;;  %v3672_v41 = vld [vmem:[%s4830_s1 + $0x88] sm:$0xff]  }
  0xb4   : > { %3357 = vmatmul.mubr.msk.bf16.gmra.mrb[76].mxu0 %vm409_vm2, %v1270_v35  ;;  %3316 = vmatprep.mubr.msk.bf16.mxu1 %vm3708_vm0, %v3707_v1  ;;  %v4176_v35 = vld [vmem:[%s3769_s23 + $0x58] sm:$0xf] }
  0xb5   : > { %3360 = vmatprep.mubr.msk.bf16.mxu0 %vm3708_vm0, %v3707_v1  ;;  %v2884_v10 = vcombine.low %v4181_v36, %v4176_v35  ;;  %v1324_v52 = vsel %vm1235_vm5, %v1314_v31, %v1323_v37  ;;  %v4256_v31 = vld [vmem:[%s3769_s23 + $0x1c] sm:$0xff]  }
  0xb6   : > { %v1808_v40 = vrot.slane %v4256_v31, 2 }
  0xb7   : > { %v1326_v48 = vshrl.u32 %v2884_v10, 16 }
  0xb9   : > { %v1328_v45 = vrot.slane %v1326_v48, 3 }
  0xbb   : > { %3317 = vmatmul.mubr.msk.bf16.gmra.mrb[80].mxu1 %vm409_vm2, %v1029_v49  ;;  %v1329_v49 = vshll.u32 %v2884_v10, 16 }
  0xbc   : > { %3361 = vmatmul.mubr.msk.bf16.gmra.mrb[80].mxu0 %vm409_vm2, %v1279_v47  ;;  %3320 = vmatprep.mubr.msk.bf16.mxu1 %vm3708_vm0, %v3707_v1  ;;  %v2866_v47 = vcombine.low %v4181_v36, %v957_v38 }
  0xbd   : > { %3364 = vmatprep.mubr.msk.bf16.mxu0 %vm3708_vm0, %v3707_v1  ;;  %v1331_v53 = vrot.slane %v1329_v49, 4 }
  0xbe   : > { %v1038_v51 = vrot.slane %v2866_v47, 3 }
  0xc0   : > { %v1039_v57 = vsel %vm1018_vm4, %v1036_v33, %v1038_v51  ;;  %v2903_v33 = vcombine.low %v4018_v44, %v4033_v54 }
  0xc3   : > { %3321 = vmatmul.mubr.msk.bf16.gmra.mrb[84].mxu1 %vm409_vm2, %v1031_v63  ;;  %v4210_v63 = vld [vmem:[%s3769_s23 + $0x10] sm:$0xf] }
  0xc4   : > { %3365 = vmatmul.mubr.msk.bf16.gmra.mrb[84].mxu0 %vm409_vm2, %v1288_v60  ;;  %3324 = vmatprep.mubr.msk.bf16.mxu1 %vm3708_vm0, %v3707_v1  ;;  %v1332_v60 = vor.u32 %v1331_v53, %v1328_v45  ;;  %v4221_v8 = vcombine.low %v1722_v62, %v4210_v63  ;;  %v4302_v62 = vld [vmem:[%s3769_s23 + $0x2c] sm:$0xff]  }
  0xc5   : > { %3368 = vmatprep.mubr.msk.bf16.mxu0 %vm3708_vm0, %v3707_v1 }
  0xc6   : > { %v1333_v61 = vsel %vm1235_vm5, %v1323_v37, %v1332_v60  ;;  %v1805_v23 = vrot.slane %v4221_v8, 2  ;;  %v4281_v37 = vld [vmem:[%s3769_s23 + $0x24] sm:$0xff]  }
  0xc7   : > { %v1810_v53 = vrot.slane %v4281_v37, 2 }
  0xcb   : > { %3325 = vmatmul.mubr.msk.bf16.gmra.mrb[88].mxu1 %vm409_vm2, %v1033_v18  ;;  %v2902_v18 = vcombine.low %v4012_v13, %v4015_v43  ;;  %v3671_v43 = vld [vmem:[%s4830_s1 + $0x78] sm:$0xff]  }
  0xcc   : > { %3369 = vmatmul.mubr.msk.bf16.gmra.mrb[88].mxu0 %vm409_vm2, %v1297_v15  ;;  %3328 = vmatprep.mubr.msk.bf16.mxu1 %vm3708_vm0, %v3707_v1  ;;  %v4224_v15 = vld [vmem:[%s3769_s23 + $0x14] sm:$0xff]  }
  0xcd   : > { %3372 = vmatprep.mubr.msk.bf16.mxu0 %vm3708_vm0, %v3707_v1  ;;  %v1806_v24 = vrot.slane %v4224_v15, 2 }
  0xcf   : > { %v1809_v47 = vsel %vm1804_vm6, %v1806_v24, %v1808_v40 }
  0xd3   : > { %3329 = vmatmul.mubr.msk.bf16.gmra.mrb[92].mxu1 %vm409_vm2, %v1035_v5  ;;  %v1807_v5 = vsel %vm1804_vm6, %v1805_v23, %v1806_v24 }
  0xd4   : > { %3373 = vmatmul.mubr.msk.bf16.gmra.mrb[92].mxu0 %vm409_vm2, %v1306_v4  ;;  %3332 = vmatprep.mubr.msk.bf16.mxu1 %vm3708_vm0, %v3707_v1 }
  0xd5   : > { %3376 = vmatprep.mubr.msk.bf16.mxu0 %vm3708_vm0, %v3707_v1 }
  0xdb   : > { %3333 = vmatmul.mubr.msk.bf16.gmra.mrb[96].mxu1 %vm409_vm2, %v1037_v11 }
  0xdc   : > { %3377 = vmatmul.mubr.msk.bf16.gmra.mrb[96].mxu0 %vm409_vm2, %v1315_v39  ;;  %3336 = vmatprep.mubr.msk.bf16.mxu1 %vm3708_vm0, %v3707_v1 }
  0xdd   : > { %3380 = vmatprep.mubr.msk.bf16.mxu0 %vm3708_vm0, %v3707_v1 }
  0xe3   : > { %3337 = vmatmul.mubr.msk.bf16.gmra.mrb[100].mxu1 %vm409_vm2, %v1039_v57 }
  0xe4   : > { %3381 = vmatmul.mubr.msk.bf16.gmra.mrb[100].mxu0 %vm409_vm2, %v1324_v52  ;;  %3340 = vmatprep.mubr.msk.bf16.mxu1 %vm3708_vm0, %v3707_v1 }
  0xe5   : > { %3384 = vmatprep.mubr.msk.bf16.mxu0 %vm3708_vm0, %v3707_v1 }
  0xeb   : > { %3341 = vmatmul.mubr.msk.bf16.gmra.mrb[104].mxu1 %vm409_vm2, %v1038_v51  ;;  %v2904_v51 = vcombine.low %v4036_v55, %v4056_v56  ;;  %v1811_v56 = vsel %vm1804_vm6, %v1808_v40, %v1810_v53 }
  0xec   : > { %3385 = vmatmul.mubr.msk.bf16.gmra.mrb[104].mxu0 %vm409_vm2, %v1333_v61  ;;  %3396 = vmatprep.mubr.msk.bf16.mxu1 %vm3708_vm0, %v3707_v1 }
  0xed   : > { %3388 = vmatprep.mubr.msk.bf16.mxu0 %vm3708_vm0, %v3707_v1 }
  0xee   : > { %v4218_v7 = vpop.f32.mrb[0].mxu1 }
  0xef   : > { %v4212_v0 = vpop.f32.mrb[0].mxu0  ;;  %v3182_v17 = vpop.f32.mrb[1].mxu1 }
  0xf0   : > { %v3158_v2 = vpop.f32.mrb[1].mxu0  ;;  %v4228_v19 = vpop.f32.mrb[2].mxu1  ;;  %v2905_v17 = vcombine.low %v4059_v9, %v4081_v26 }
  0xf1   : > { %v4216_v3 = vpop.f32.mrb[2].mxu0  ;;  %v3183_v21 = vpop.f32.mrb[3].mxu1 }
  0xf2   : > { %v3159_v16 = vpop.f32.mrb[3].mxu0  ;;  %v1812_v21 = vrot.slane %v4302_v62, 2 }
  0xf3   : > { %3397 = vmatmul.mubr.msk.bf16.vlgmr.msra.gmra.mrb[108].mxu1 %vm409_vm2, %v2902_v18 }
  0xf4   : > { %3389 = vmatmul.mubr.msk.bf16.gmra.mrb[108].mxu0 %vm409_vm2, %v1332_v60  ;;  %3489 = vmatpush3.bf16.msra.mxu1 %v3656_v20  ;;  %v1813_v26 = vsel %vm1804_vm6, %v1810_v53, %v1812_v21 }
  0xf5   : > { %3444 = vmatprep.mubr.msk.bf16.mxu0 %vm3708_vm0, %v3707_v1  ;;  %3400 = vmatprep.mubr.msk.bf16.mxu1 %vm3708_vm0, %v3707_v1 }
  0xf6   : > { %3490 = vmatprep.subr.bf16.mxu1 %v3707_v1  ;;  %v4249_v29 = vpop.f32.mrb[4].mxu1 }
  0xf7   : > { %v4239_v13 = vpop.f32.mrb[4].mxu0  ;;  %v3186_v6 = vpop.f32.mrb[5].mxu1 }
  0xf8   : > { %v3162_v4 = vpop.f32.mrb[5].mxu0  ;;  %v4260_v38 = vpop.f32.mrb[6].mxu1  ;;  %3491 = vmatpush3.bf16.msra.mxu1 %v3671_v43 }
  0xf9   : > { %v4247_v22 = vpop.f32.mrb[6].mxu0  ;;  %v3187_v39 = vpop.f32.mrb[7].mxu1  ;;  %v4323_v4 = vld [vmem:[%s3769_s23 + $0x34] sm:$0xff]  }
  0xfa   : > { %v3163_v32 = vpop.f32.mrb[7].mxu0  ;;  %v1814_v39 = vrot.slane %v4323_v4, 2 }
  0xfb   : > { %3401 = vmatmul.mubr.msk.bf16.gmra.mrb[112].mxu1 %vm409_vm2, %v2903_v33  ;;  %v2906_v32 = vcombine.low %v4084_v27, %v4098_v34  ;;  %v4340_v34 = vld [vmem:[%s3769_s23 + $0x3c] sm:$0xff]  }
  0xfc   : > { %3445 = vmatmul.mubr.msk.bf16.vlgmr.msra.gmra.mrb[112].mxu0 %vm409_vm2, %v1807_v5  ;;  %3404 = vmatprep.mubr.msk.bf16.mxu1 %vm3708_vm0, %v3707_v1  ;;  %v1815_v27 = vsel %vm1804_vm6, %v1812_v21, %v1814_v39 }
  0xfd   : > { %3537 = vmatpush3.bf16.msra.mxu0 %v3660_v30  ;;  %3448 = vmatprep.mubr.msk.bf16.mxu0 %vm3708_vm0, %v3707_v1 }
  0xfe   : > { %3538 = vmatprep.subr.bf16.mxu0 %v3707_v1  ;;  %v4277_v11 = vpop.f32.mrb[8].mxu1 }
  0xff   : > { %v4271_v44 = vpop.f32.mrb[8].mxu0  ;;  %v3190_v49 = vpop.f32.mrb[9].mxu1 }
 0x100   : > { %v3166_v54 = vpop.f32.mrb[9].mxu0  ;;  %v4285_v52 = vpop.f32.mrb[10].mxu1 }
 0x101   : > { %v4275_v10 = vpop.f32.mrb[10].mxu0  ;;  %3539 = vmatpush3.bf16.msra.mxu0 %v3672_v41  ;;  %v3191_v45 = vpop.f32.mrb[11].mxu1 }
 0x102   : > { %v3167_v48 = vpop.f32.mrb[11].mxu0  ;;  %v2907_v45 = vcombine.low %v4101_v12, %v4114_v42 }
 0x103   : > { %3405 = vmatmul.mubr.msk.bf16.gmra.mrb[116].mxu1 %vm409_vm2, %v2904_v51 }
 0x104   : > { %3449 = vmatmul.mubr.msk.bf16.gmra.mrb[116].mxu0 %vm409_vm2, %v1809_v47  ;;  %3408 = vmatprep.mubr.msk.bf16.mxu1 %vm3708_vm0, %v3707_v1 }
 0x105   : > { %3452 = vmatprep.mubr.msk.bf16.mxu0 %vm3708_vm0, %v3707_v1 }
 0x106   : > { %v4298_v55 = vpop.f32.mrb[12].mxu1 }
 0x107   : > { %v4292_v57 = vpop.f32.mrb[12].mxu0  ;;  %v3194_v16 = vpop.f32.mrb[13].mxu1 }
 0x108   : > { %v3170_v60 = vpop.f32.mrb[13].mxu0  ;;  %v4306_v18 = vpop.f32.mrb[14].mxu1 }
 0x109   : > { %v4296_v61 = vpop.f32.mrb[14].mxu0  ;;  %v3195_v20 = vpop.f32.mrb[15].mxu1 }
 0x10a   : > { %v3171_v2 = vpop.f32.mrb[15].mxu0  ;;  %v4357_v20 = vld [vmem:[%s3769_s23 + $0x44] sm:$0xff]  }
 0x10b   : > { %3409 = vmatmul.mubr.msk.bf16.gmra.mrb[120].mxu1 %vm409_vm2, %v2905_v17  ;;  %v1816_v2 = vrot.slane %v4340_v34, 2 }
 0x10c   : > { %3453 = vmatmul.mubr.msk.bf16.gmra.mrb[120].mxu0 %vm409_vm2, %v1811_v56  ;;  %3412 = vmatprep.mubr.msk.bf16.mxu1 %vm3708_vm0, %v3707_v1 }
 0x10d   : > { %3456 = vmatprep.mubr.msk.bf16.mxu0 %vm3708_vm0, %v3707_v1 }
 0x10e   : > { %v4319_v9 = vpop.f32.mrb[16].mxu1 }
 0x10f   : > { %v4313_v23 = vpop.f32.mrb[16].mxu0  ;;  %v3198_v30 = vpop.f32.mrb[17].mxu1 }
 0x110   : > { %v3174_v24 = vpop.f32.mrb[17].mxu0  ;;  %v560_v6 = vpop.f32.mrb[18].mxu1  ;;  %v2908_v30 = vcombine.low %v4117_v46, %v4130_v58 }
 0x111   : > { %v4317_v43 = vpop.f32.mrb[18].mxu0  ;;  %v3199_v33 = vpop.f32.mrb[19].mxu1 }
 0x112   : > { %v3175_v5 = vpop.f32.mrb[19].mxu0 }
 0x113   : > { %3413 = vmatmul.mubr.msk.bf16.gmra.mrb[124].mxu1 %vm409_vm2, %v2906_v32 }
 0x114   : > { %3457 = vmatmul.mubr.msk.bf16.gmra.mrb[124].mxu0 %vm409_vm2, %v1813_v26  ;;  %3416 = vmatprep.mubr.msk.bf16.mxu1 %vm3708_vm0, %v3707_v1 }
 0x115   : > { %3460 = vmatprep.mubr.msk.bf16.mxu0 %vm3708_vm0, %v3707_v1 }
 0x116   : > { %v633_v54 = vpop.f32.mrb[20].mxu1 }
 0x117   : > { %v4332_v40 = vpop.f32.mrb[20].mxu0  ;;  %v634_v48 = vadd.f32 %v633_v54, %v4212_v0  ;;  %v3206_v49 = vpop.f32.mrb[21].mxu1 }
 0x118   : > { %v3178_v41 = vpop.f32.mrb[21].mxu0  ;;  %v636_v53 = vpop.f32.mrb[22].mxu1 }
 0x119   : > { %v4336_v47 = vpop.f32.mrb[22].mxu0  ;;  %v637_v60 = vadd.f32 %v636_v53, %v4216_v3  ;;  %v3207_v56 = vpop.f32.mrb[23].mxu1  ;;  %v1817_v3 = vsel %vm1804_vm6, %v1814_v39, %v1816_v2  ;;  %v1818_v39 = vrot.slane %v4357_v20, 2  ;;  %v2909_v53 = vcombine.low %v4133_v59, %v4146_v50 }
 0x11a   : > { %v3179_v51 = vpop.f32.mrb[23].mxu0 }
 0x11b   : > { %3417 = vmatmul.mubr.msk.bf16.gmra.mrb[128].mxu1 %vm409_vm2, %v2907_v45 }
 0x11c   : > { %3461 = vmatmul.mubr.msk.bf16.gmra.mrb[128].mxu0 %vm409_vm2, %v1815_v27  ;;  %3420 = vmatprep.mubr.msk.bf16.mxu1 %vm3708_vm0, %v3707_v1  ;;  %v4376_v27 = vld [vmem:[%s3769_s23 + $0x4c] sm:$0xff]  }
 0x11d   : > { %3464 = vmatprep.mubr.msk.bf16.mxu0 %vm3708_vm0, %v3707_v1 }
 0x11e   : > { %v641_v42 = vpop.f32.mrb[24].mxu1 }
 0x11f   : > { %v829_v0 = vpop.f32.mrb[24].mxu0  ;;  %v642_v21 = vadd.f32 %v641_v42, %v4239_v13  ;;  %v3210_v24 = vpop.f32.mrb[25].mxu1 }
 0x120   : > { %v4353_v16 = vadd.f32 %v829_v0, %v634_v48  ;;  %v3254_v12 = vpop.f32.mrb[25].mxu0  ;;  %v644_v32 = vpop.f32.mrb[26].mxu1 }
 0x121   : > { %v832_v17 = vpop.f32.mrb[26].mxu0  ;;  %v645_v6 = vadd.f32 %v644_v32, %v4247_v22  ;;  %v3211_v33 = vpop.f32.mrb[27].mxu1  ;;  %v1819_v22 = vsel %vm1804_vm6, %v1816_v2, %v1818_v39  ;;  %v1820_v2 = vrot.slane %v4376_v27, 2 }
 0x122   : > { %v4360_v26 = vadd.f32 %v832_v17, %v637_v60  ;;  %v3255_v5 = vpop.f32.mrb[27].mxu0  ;;  %v4395_v17 = vld [vmem:[%s3769_s23 + $0x54] sm:$0xff]  }
 0x123   : > { %3421 = vmatmul.mubr.msk.bf16.gmra.mrb[132].mxu1 %vm409_vm2, %v2908_v30  ;;  %v1821_v42 = vsel %vm1804_vm6, %v1818_v39, %v1820_v2  ;;  %v2910_v30 = vcombine.low %v4149_v14, %v4162_v25  ;;  %v1822_v39 = vrot.slane %v4395_v17, 2 }
 0x124   : > { %3465 = vmatmul.mubr.msk.bf16.gmra.mrb[132].mxu0 %vm409_vm2, %v1817_v3  ;;  %3424 = vmatprep.mubr.msk.bf16.mxu1 %vm3708_vm0, %v3707_v1 }
 0x125   : > { %3468 = vmatprep.mubr.msk.bf16.mxu0 %vm3708_vm0, %v3707_v1 }
 0x126   : > { %v649_v58 = vpop.f32.mrb[28].mxu1 }
 0x127   : > { %v837_v13 = vpop.f32.mrb[28].mxu0  ;;  %v650_v48 = vadd.f32 %v649_v58, %v4271_v44  ;;  %v3214_v49 = vpop.f32.mrb[29].mxu1 }
 0x128   : > { %v4372_v41 = vadd.f32 %v837_v13, %v642_v21  ;;  %v3258_v46 = vpop.f32.mrb[29].mxu0  ;;  %v652_v60 = vpop.f32.mrb[30].mxu1  ;;  %v1743_v13 = vld [vmem:[%s3769_s23 + $0x60] sm:$0x3] }
 0x129   : > { %v840_v54 = vpop.f32.mrb[30].mxu0  ;;  %v653_v56 = vadd.f32 %v652_v60, %v4275_v10  ;;  %v3215_v0 = vpop.f32.mrb[31].mxu1  ;;  %v2911_v60 = vcombine.low %v4165_v28, %v4181_v36  ;;  %v2026_v28 = vshll.u32 %v4221_v8, 16  ;;  %v2031_v36 = vshrl.u32 %v4224_v15, 16 }
 0x12a   : > { %v4379_v51 = vadd.f32 %v840_v54, %v645_v6  ;;  %v3259_v45 = vpop.f32.mrb[31].mxu0  ;;  %v1823_v54 = vsel %vm1804_vm6, %v1820_v2, %v1822_v39 }
 0x12b   : > { %3425 = vmatmul.mubr.msk.bf16.gmra.mrb[136].mxu1 %vm409_vm2, %v2909_v53 }
 0x12c   : > { %3469 = vmatmul.mubr.msk.bf16.gmra.mrb[136].mxu0 %vm409_vm2, %v1819_v22  ;;  %3428 = vmatprep.mubr.msk.bf16.mxu1 %vm3708_vm0, %v3707_v1 }
 0x12d   : > { %3472 = vmatprep.mubr.msk.bf16.mxu0 %vm3708_vm0, %v3707_v1 }
 0x12e   : > { %v657_v50 = vpop.f32.mrb[32].mxu1 }
 0x12f   : > { %v845_v44 = vpop.f32.mrb[32].mxu0  ;;  %v658_v3 = vadd.f32 %v657_v50, %v4292_v57  ;;  %v3218_v21 = vpop.f32.mrb[33].mxu1  ;;  %v4409_v57 = vld [vmem:[%s3769_s23 + $0x5c] sm:$0xf] }
 0x130   : > { %v4391_v12 = vadd.f32 %v845_v44, %v650_v48  ;;  %v3262_v59 = vpop.f32.mrb[33].mxu0  ;;  %v660_v32 = vpop.f32.mrb[34].mxu1  ;;  %v2940_v22 = vcombine.low %v4409_v57, %v1743_v13 }
 0x131   : > { %v848_v10 = vpop.f32.mrb[34].mxu0  ;;  %v661_v6 = vadd.f32 %v660_v32, %v4296_v61  ;;  %v3219_v33 = vpop.f32.mrb[35].mxu1  ;;  %v2023_v59 = vshrl.u32 %v4221_v8, 16  ;;  %v2912_v8 = vcombine.low %v4176_v35, %v4176_v35 }
 0x132   : > { %v4398_v24 = vadd.f32 %v848_v10, %v653_v56  ;;  %v3263_v5 = vpop.f32.mrb[35].mxu0  ;;  %v1824_v2 = vrot.slane %v2940_v22, 2 }
 0x133   : > { %3429 = vmatmul.mubr.msk.bf16.gmra.mrb[140].mxu1 %vm409_vm2, %v2910_v30  ;;  %v2025_v13 = vrot.slane %v2023_v59, 2 }
 0x134   : > { %3473 = vmatmul.mubr.msk.bf16.gmra.mrb[140].mxu0 %vm409_vm2, %v1821_v42  ;;  %3432 = vmatprep.mubr.msk.bf16.mxu1 %vm3708_vm0, %v3707_v1  ;;  %v1825_v21 = vsel %vm1804_vm6, %v1822_v39, %v1824_v2 }
 0x135   : > { %3476 = vmatprep.mubr.msk.bf16.mxu0 %vm3708_vm0, %v3707_v1 }
 0x136   : > { %v665_v61 = vpop.f32.mrb[36].mxu1 }
 0x137   : > { %v853_v46 = vpop.f32.mrb[36].mxu0  ;;  %v666_v48 = vadd.f32 %v665_v61, %v4313_v23  ;;  %v3222_v49 = vpop.f32.mrb[37].mxu1 }
 0x138   : > { %v4414_v14 = vadd.f32 %v853_v46, %v658_v3  ;;  %v3266_v25 = vpop.f32.mrb[37].mxu0  ;;  %v668_v56 = vpop.f32.mrb[38].mxu1  ;;  %v2028_v46 = vrot.slane %v2026_v28, 3  ;;  %v2043_v49 = vshll.u32 %v4256_v31, 16 }
 0x139   : > { %v856_v58 = vpop.f32.mrb[38].mxu0  ;;  %v669_v0 = vadd.f32 %v668_v56, %v4317_v43  ;;  %v3223_v44 = vpop.f32.mrb[39].mxu1  ;;  %v2034_v43 = vshll.u32 %v4224_v15, 16  ;;  %v2033_v25 = vrot.slane %v2031_v36, 2 }
 0x13a   : > { %v4419_v45 = vadd.f32 %v856_v58, %v661_v6  ;;  %v3267_v53 = vpop.f32.mrb[39].mxu0  ;;  %v2029_v35 = vor.u32 %v2028_v46, %v2025_v13 }
 0x13b   : > { %3433 = vmatmul.mubr.msk.bf16.gmra.mrb[144].mxu1 %vm409_vm2, %v2911_v60  ;;  %v2036_v61 = vrot.slane %v2034_v43, 3 }
 0x13c   : > { %3477 = vmatmul.mubr.msk.bf16.gmra.mrb[144].mxu0 %vm409_vm2, %v1823_v54  ;;  %3436 = vmatprep.mubr.msk.bf16.mxu1 %vm3708_vm0, %v3707_v1 }
 0x13d   : > { %3480 = vmatprep.mubr.msk.bf16.mxu0 %vm3708_vm0, %v3707_v1  ;;  %v2037_v22 = vor.u32 %v2036_v61, %v2033_v25 }
 0x13e   : > { %v673_v42 = vpop.f32.mrb[40].mxu1 }
 0x13f   : > { %v861_v23 = vpop.f32.mrb[40].mxu0  ;;  %v674_v5 = vadd.f32 %v673_v42, %v4332_v40  ;;  %v3226_v30 = vpop.f32.mrb[41].mxu1  ;;  %v2306_v40 = vld [vmem:[%s3769_s23 + $0xc] sm:$0x8]  ;;  %v2038_v43 = vsel %vm2021_vm7, %v2029_v35, %v2037_v22  ;;  %v2045_v42 = vrot.slane %v2043_v49, 3 }
 0x140   : > { %v4434_v50 = vadd.f32 %v861_v23, %v666_v48  ;;  %v3270_v10 = vpop.f32.mrb[41].mxu0  ;;  %v676_v33 = vpop.f32.mrb[42].mxu1  ;;  %v2040_v48 = vshrl.u32 %v4256_v31, 16 }
 0x141   : > { %v864_v3 = vpop.f32.mrb[42].mxu0  ;;  %v677_v58 = vadd.f32 %v676_v33, %v4336_v47  ;;  %v3227_v39 = vpop.f32.mrb[43].mxu1 }
 0x142   : > { %v4438_v32 = vadd.f32 %v864_v3, %v669_v0  ;;  %v3271_v6 = vpop.f32.mrb[43].mxu0  ;;  %v2976_v0 = vcombine.low %v2306_v40, %v4210_v63  ;;  %v2042_v10 = vrot.slane %v2040_v48, 2 }
 0x143   : > { %3437 = vmatmul.mubr.msk.bf16.gmra.mrb[148].mxu1 %vm409_vm2, %v2912_v8  ;;  %v2049_v6 = vshrl.u32 %v4281_v37, 16 }
 0x144   : > { %3481 = vmatmul.mubr.msk.bf16.gmra.mrb[148].mxu0 %vm409_vm2, %v1825_v21  ;;  %3492 = vmatprep.mubr.msk.bf16.mxu1 %vm3708_vm0, %v3707_v1  ;;  %v2315_v63 = vrot.slane %v2976_v0, 3  ;;  %v2046_v30 = vor.u32 %v2045_v42, %v2042_v10 }
 0x145   : > { %3484 = vmatprep.mubr.msk.bf16.mxu0 %vm3708_vm0, %v3707_v1 }
 0x146   : > { %v681_v60 = vpop.f32.mrb[44].mxu1  ;;  %v2047_v40 = vsel %vm2021_vm7, %v2037_v22, %v2046_v30  ;;  %v2058_v22 = vshrl.u32 %v4302_v62, 16 }
 0x147   : > { %v869_v54 = vpop.f32.mrb[44].mxu0  ;;  %v682_v44 = vadd.f32 %v681_v60, %v4218_v7  ;;  %v3230_v23 = vpop.f32.mrb[45].mxu1  ;;  %v2316_v7 = vrot.slane %v4224_v15, 3 }
 0x148   : > { %v4452_v47 = vadd.f32 %v869_v54, %v674_v5  ;;  %v3274_v53 = vpop.f32.mrb[45].mxu0  ;;  %v684_v36 = vpop.f32.mrb[46].mxu1  ;;  %v2051_v54 = vrot.slane %v2049_v6, 2 }
 0x149   : > { %v872_v56 = vpop.f32.mrb[46].mxu0  ;;  %v685_v3 = vadd.f32 %v684_v36, %v4228_v19  ;;  %v3231_v21 = vpop.f32.mrb[47].mxu1  ;;  %v2052_v19 = vshll.u32 %v4281_v37, 16  ;;  %v2317_v46 = vsel %vm1018_vm4, %v2315_v63, %v2316_v7  ;;  %v2318_v53 = vrot.slane %v4256_v31, 3 }
 0x14a   : > { %v4456_v59 = vadd.f32 %v872_v56, %v677_v58  ;;  %v3275_v28 = vpop.f32.mrb[47].mxu0  ;;  %v2061_v56 = vshll.u32 %v4302_v62, 16  ;;  %v2060_v21 = vrot.slane %v2058_v22, 2 }
 0x14b   : > { %3493 = vmatmul.mubr.msk.bf16.vlgmr.msra.gmra.mrb[152].mxu1 %vm409_vm2, %v2038_v43  ;;  %v2054_v35 = vrot.slane %v2052_v19, 3  ;;  %v2319_v28 = vsel %vm1018_vm4, %v2316_v7, %v2318_v53  ;;  %v2320_v7 = vrot.slane %v4281_v37, 3 }
 0x14c   : > { %3485 = vmatmul.mubr.msk.bf16.gmra.mrb[152].mxu0 %vm409_vm2, %v1824_v2  ;;  %3496 = vmatprep.mubr.msk.bf16.mxu1 %vm3708_vm0, %v3707_v1  ;;  %v2063_v63 = vrot.slane %v2061_v56, 3  ;;  %v2079_v56 = vshll.u32 %v4340_v34, 16 }
 0x14d   : > { %3540 = vmatprep.mubr.msk.bf16.mxu0 %vm3708_vm0, %v3707_v1  ;;  %v2055_v60 = vor.u32 %v2054_v35, %v2051_v54 }
 0x14e   : > { %v689_v33 = vpop.f32.mrb[48].mxu1  ;;  %v2064_v19 = vor.u32 %v2063_v63, %v2060_v21  ;;  %v2081_v63 = vrot.slane %v2079_v56, 3 }
 0x14f   : > { %v877_v5 = vpop.f32.mrb[48].mxu0  ;;  %v690_v15 = vadd.f32 %v689_v33, %v4249_v29  ;;  %v3234_v25 = vpop.f32.mrb[49].mxu1 }
 0x150   : > { %v4469_v8 = vadd.f32 %v877_v5, %v682_v44  ;;  %v3278_v2 = vpop.f32.mrb[49].mxu0  ;;  %v692_v39 = vpop.f32.mrb[50].mxu1  ;;  %v2065_v54 = vsel %vm2021_vm7, %v2055_v60, %v2064_v19 }
 0x151   : > { %v880_v13 = vpop.f32.mrb[50].mxu0  ;;  %v693_v48 = vadd.f32 %v692_v39, %v4260_v38  ;;  %v3235_v49 = vpop.f32.mrb[51].mxu1  ;;  %v2070_v2 = vshll.u32 %v4323_v4, 16 }
 0x152   : > { %v4473_v61 = vadd.f32 %v880_v13, %v685_v3  ;;  %v3279_v58 = vpop.f32.mrb[51].mxu0  ;;  %v2056_v3 = vsel %vm2021_vm7, %v2046_v30, %v2055_v60  ;;  %v2067_v30 = vshrl.u32 %v4323_v4, 16  ;;  %v2076_v60 = vshrl.u32 %v4340_v34, 16 }
 0x153   : > { %3497 = vmatmul.mubr.msk.bf16.gmra.mrb[156].mxu1 %vm409_vm2, %v2047_v40 }
 0x154   : > { %3541 = vmatmul.mubr.msk.bf16.vlgmr.msra.gmra.mrb[156].mxu0 %vm409_vm2, %v2317_v46  ;;  %3500 = vmatprep.mubr.msk.bf16.mxu1 %vm3708_vm0, %v3707_v1  ;;  %v2069_v35 = vrot.slane %v2067_v30, 2  ;;  %v2078_v21 = vrot.slane %v2076_v60, 2 }
 0x155   : > { %3544 = vmatprep.mubr.msk.bf16.mxu0 %vm3708_vm0, %v3707_v1 }
 0x156   : > { %v697_v44 = vpop.f32.mrb[52].mxu1 }
 0x157   : > { %v885_v29 = vpop.f32.mrb[52].mxu0  ;;  %v698_v31 = vadd.f32 %v697_v44, %v4277_v11  ;;  %v3238_v36 = vpop.f32.mrb[53].mxu1 }
 0x158   : > { %v4486_v38 = vadd.f32 %v885_v29, %v690_v15  ;;  %v3282_v0 = vpop.f32.mrb[53].mxu0  ;;  %v700_v42 = vpop.f32.mrb[54].mxu1  ;;  %v2321_v15 = vsel %vm1018_vm4, %v2318_v53, %v2320_v7  ;;  %v2322_v53 = vrot.slane %v4302_v62, 3 }
 0x159   : > { %v888_v23 = vpop.f32.mrb[54].mxu0  ;;  %v701_v5 = vadd.f32 %v700_v42, %v4285_v52  ;;  %v3239_v6 = vpop.f32.mrb[55].mxu1 }
 0x15a   : > { %v4490_v43 = vadd.f32 %v888_v23, %v693_v48  ;;  %v3283_v10 = vpop.f32.mrb[55].mxu0  ;;  %v2072_v48 = vrot.slane %v2070_v2, 3  ;;  %v2324_v6 = vrot.slane %v4323_v4, 3 }
 0x15b   : > { %3501 = vmatmul.mubr.msk.bf16.gmra.mrb[160].mxu1 %vm409_vm2, %v2056_v3 }
 0x15c   : > { %3545 = vmatmul.mubr.msk.bf16.gmra.mrb[160].mxu0 %vm409_vm2, %v2319_v28  ;;  %3504 = vmatprep.mubr.msk.bf16.mxu1 %vm3708_vm0, %v3707_v1  ;;  %v2073_v22 = vor.u32 %v2072_v48, %v2069_v35  ;;  %v2323_v28 = vsel %vm1018_vm4, %v2320_v7, %v2322_v53  ;;  %v2082_v7 = vor.u32 %v2081_v63, %v2078_v21 }
 0x15d   : > { %3548 = vmatprep.mubr.msk.bf16.mxu0 %vm3708_vm0, %v3707_v1 }
 0x15e   : > { %v705_v13 = vpop.f32.mrb[56].mxu1  ;;  %v2074_v3 = vsel %vm2021_vm7, %v2064_v19, %v2073_v22  ;;  %v2088_v19 = vshll.u32 %v4357_v20, 16 }
 0x15f   : > { %v893_v11 = vpop.f32.mrb[56].mxu0  ;;  %v706_v37 = vadd.f32 %v705_v13, %v4298_v55  ;;  %v3242_v25 = vpop.f32.mrb[57].mxu1 }
 0x160   : > { %v4503_v52 = vadd.f32 %v893_v11, %v698_v31  ;;  %v3286_v33 = vpop.f32.mrb[57].mxu0  ;;  %v708_v40 = vpop.f32.mrb[58].mxu1  ;;  %v2085_v11 = vshrl.u32 %v4357_v20, 16 }
 0x161   : > { %v896_v46 = vpop.f32.mrb[58].mxu0  ;;  %v709_v49 = vadd.f32 %v708_v40, %v4306_v18  ;;  %v3243_v29 = vpop.f32.mrb[59].mxu1 }
 0x162   : > { %v4507_v58 = vadd.f32 %v896_v46, %v701_v5  ;;  %v3287_v39 = vpop.f32.mrb[59].mxu0  ;;  %v2325_v46 = vsel %vm1018_vm4, %v2322_v53, %v2324_v6  ;;  %v2087_v40 = vrot.slane %v2085_v11, 2  ;;  %v2094_v53 = vshrl.u32 %v4376_v27, 16 }
 0x163   : > { %3505 = vmatmul.mubr.msk.bf16.gmra.mrb[164].mxu1 %vm409_vm2, %v2065_v54  ;;  %v2083_v39 = vsel %vm2021_vm7, %v2073_v22, %v2082_v7  ;;  %v2090_v54 = vrot.slane %v2088_v19, 3 }
 0x164   : > { %3549 = vmatmul.mubr.msk.bf16.gmra.mrb[164].mxu0 %vm409_vm2, %v2321_v15  ;;  %3508 = vmatprep.mubr.msk.bf16.mxu1 %vm3708_vm0, %v3707_v1 }
 0x165   : > { %3552 = vmatprep.mubr.msk.bf16.mxu0 %vm3708_vm0, %v3707_v1  ;;  %v2091_v29 = vor.u32 %v2090_v54, %v2087_v40 }
 0x166   : > { %v713_v44 = vpop.f32.mrb[60].mxu1 }
 0x167   : > { %v901_v55 = vpop.f32.mrb[60].mxu0  ;;  %v714_v62 = vadd.f32 %v713_v44, %v4319_v9  ;;  %v3246_v10 = vpop.f32.mrb[61].mxu1 }
 0x168   : > { %v4520_v18 = vadd.f32 %v901_v55, %v706_v37  ;;  %v3290_v0 = vpop.f32.mrb[61].mxu0  ;;  %v716_v42 = vpop.f32.mrb[62].mxu1  ;;  %v2097_v55 = vshll.u32 %v4376_v27, 16  ;;  %v2096_v10 = vrot.slane %v2094_v53, 2 }
 0x169   : > { %v904_v23 = vpop.f32.mrb[62].mxu0  ;;  %v3247_v5 = vpop.f32.mrb[63].mxu1 }
 0x16a   : > { %v4524_v31 = vadd.f32 %v904_v23, %v709_v49  ;;  %v3291_v36 = vpop.f32.mrb[63].mxu0  ;;  %v2326_v49 = vrot.slane %v4340_v34, 3  ;;  %v2099_v42 = vrot.slane %v2097_v55, 3 }
 0x16b   : > { %3509 = vmatmul.mubr.msk.bf16.gmra.mrb[168].mxu1 %vm409_vm2, %v2074_v3  ;;  %v2092_v36 = vsel %vm2021_vm7, %v2082_v7, %v2091_v29 }
 0x16c   : > { %3553 = vmatmul.mubr.msk.bf16.gmra.mrb[168].mxu0 %vm409_vm2, %v2323_v28  ;;  %3512 = vmatprep.mubr.msk.bf16.mxu1 %vm3708_vm0, %v3707_v1  ;;  %v2327_v0 = vsel %vm1018_vm4, %v2324_v6, %v2326_v49  ;;  %v2100_v5 = vor.u32 %v2099_v42, %v2096_v10  ;;  %v2103_v6 = vshrl.u32 %v4395_v17, 16  ;;  %v2332_v42 = vrot.slane %v4395_v17, 3 }
 0x16d   : > { %3556 = vmatprep.mubr.msk.bf16.mxu0 %vm3708_vm0, %v3707_v1 }
 0x16e   : > { %v1119_v33 = vpop.f32.mrb[64].mxu1 }
 0x16f   : > { %v909_v9 = vpop.f32.mrb[64].mxu0  ;;  %v1205_v4 = vadd.f32 %v1119_v33, %v4353_v16  ;;  %v3302_v15 = vpop.f32.mrb[65].mxu1 }
 0x170   : > { %v4536_v30 = vadd.f32 %v909_v9, %v714_v62  ;;  %v3294_v2 = vpop.f32.mrb[65].mxu0  ;;  %v1122_v25 = vpop.f32.mrb[66].mxu1  ;;  %v2106_v9 = vshll.u32 %v4395_v17, 16 }
 0x171   : > { %v912_v13 = vpop.f32.mrb[66].mxu0  ;;  %v1206_v35 = vadd.f32 %v1122_v25, %v4360_v26  ;;  %v3303_v48 = vpop.f32.mrb[67].mxu1  ;;  %v2101_v25 = vsel %vm2021_vm7, %v2091_v29, %v2100_v5 }
 0x172   : > { %v3295_v37 = vpop.f32.mrb[67].mxu0  ;;  %v2108_v40 = vrot.slane %v2106_v9, 3 }
 0x173   : > { %3513 = vmatmul.mubr.msk.bf16.gmra.mrb[172].mxu1 %vm409_vm2, %v2083_v39  ;;  %v2105_v39 = vrot.slane %v2103_v6, 2 }
 0x174   : > { %3557 = vmatmul.mubr.msk.bf16.gmra.mrb[172].mxu0 %vm409_vm2, %v2325_v46  ;;  %3516 = vmatprep.mubr.msk.bf16.mxu1 %vm3708_vm0, %v3707_v1 }
 0x175   : > { %3560 = vmatprep.mubr.msk.bf16.mxu0 %vm3708_vm0, %v3707_v1 }
 0x176   : > { %v1127_v60 = vpop.f32.mrb[68].mxu1 }
 0x177   : > { %v1413_v16 = vpop.f32.mrb[68].mxu0  ;;  %v1207_v34 = vadd.f32 %v1127_v60, %v4372_v41  ;;  %v3306_v44 = vpop.f32.mrb[69].mxu1  ;;  %v2328_v41 = vrot.slane %v4357_v20, 3 }
 0x178   : > { %v4551_v26 = vadd.f32 %v1413_v16, %v1205_v4  ;;  %v3350_v22 = vpop.f32.mrb[69].mxu0  ;;  %v1130_v62 = vpop.f32.mrb[70].mxu1 }
 0x179   : > { %v1416_v56 = vpop.f32.mrb[70].mxu0  ;;  %v1208_v3 = vadd.f32 %v1130_v62, %v4379_v51  ;;  %v3307_v21 = vpop.f32.mrb[71].mxu1  ;;  %v2012_v51 = vld [vmem:[%s3769_s23 + $0x60] sm:$0x7]  ;;  %v2329_v33 = vsel %vm1018_vm4, %v2326_v49, %v2328_v41 }
 0x17a   : > { %v4555_v23 = vadd.f32 %v1416_v56, %v1206_v35  ;;  %v3351_v28 = vpop.f32.mrb[71].mxu0  ;;  %v4576_v15 = vcombine.low %v4409_v57, %v2012_v51  ;;  %v2109_v57 = vor.u32 %v2108_v40, %v2105_v39 }
 0x17b   : > { %3517 = vmatmul.mubr.msk.bf16.gmra.mrb[176].mxu1 %vm409_vm2, %v2092_v36 }
 0x17c   : > { %3561 = vmatmul.mubr.msk.bf16.gmra.mrb[176].mxu0 %vm409_vm2, %v2327_v0  ;;  %3520 = vmatprep.mubr.msk.bf16.mxu1 %vm3708_vm0, %v3707_v1  ;;  %v2112_v49 = vshrl.u32 %v4576_v15, 16  ;;  %v2115_v16 = vshll.u32 %v4576_v15, 16  ;;  %v2110_v44 = vsel %vm2021_vm7, %v2100_v5, %v2109_v57 }
 0x17d   : > { %3564 = vmatprep.mubr.msk.bf16.mxu0 %vm3708_vm0, %v3707_v1 }
 0x17e   : > { %v1135_v19 = vpop.f32.mrb[72].mxu1  ;;  %v2114_v28 = vrot.slane %v2112_v49, 2  ;;  %v2117_v62 = vrot.slane %v2115_v16, 3 }
 0x17f   : > { %v1421_v63 = vpop.f32.mrb[72].mxu0  ;;  %v1209_v20 = vadd.f32 %v1135_v19, %v4391_v12  ;;  %v3310_v13 = vpop.f32.mrb[73].mxu1  ;;  %v2330_v12 = vrot.slane %v4376_v27, 3 }
 0x180   : > { %v4569_v7 = vadd.f32 %v1421_v63, %v1207_v34  ;;  %v3354_v11 = vpop.f32.mrb[73].mxu0  ;;  %v1138_v37 = vpop.f32.mrb[74].mxu1 }
 0x181   : > { %v1424_v2 = vpop.f32.mrb[74].mxu0  ;;  %v1210_v54 = vadd.f32 %v1138_v37, %v4398_v24  ;;  %v3311_v35 = vpop.f32.mrb[75].mxu1  ;;  %v2331_v22 = vsel %vm1018_vm4, %v2328_v41, %v2330_v12  ;;  %v2333_v5 = vsel %vm1018_vm4, %v2330_v12, %v2332_v42 }
 0x182   : > { %v4573_v46 = vadd.f32 %v1424_v2, %v1208_v3  ;;  %v3355_v4 = vpop.f32.mrb[75].mxu0  ;;  %v2118_v3 = vor.u32 %v2117_v62, %v2114_v28 }
 0x183   : > { %3521 = vmatmul.mubr.msk.bf16.gmra.mrb[180].mxu1 %vm409_vm2, %v2101_v25 }
 0x184   : > { %3565 = vmatmul.mubr.msk.bf16.gmra.mrb[180].mxu0 %vm409_vm2, %v2329_v33  ;;  %3524 = vmatprep.mubr.msk.bf16.mxu1 %vm3708_vm0, %v3707_v1  ;;  %v2119_v19 = vsel %vm2021_vm7, %v2109_v57, %v2118_v3 }
 0x185   : > { %3568 = vmatprep.mubr.msk.bf16.mxu0 %vm3708_vm0, %v3707_v1 }
 0x186   : > { %v1143_v53 = vpop.f32.mrb[76].mxu1 }
 0x187   : > { %v1429_v48 = vpop.f32.mrb[76].mxu0  ;;  %v1211_v27 = vadd.f32 %v1143_v53, %v4414_v14  ;;  %v3314_v60 = vpop.f32.mrb[77].mxu1 }
 0x188   : > { %v4589_v24 = vadd.f32 %v1429_v48, %v1209_v20  ;;  %v3358_v29 = vpop.f32.mrb[77].mxu0  ;;  %v1146_v34 = vpop.f32.mrb[78].mxu1  ;;  %v2334_v20 = vrot.slane %v4576_v15, 3 }
 0x189   : > { %v1432_v55 = vpop.f32.mrb[78].mxu0  ;;  %v1212_v36 = vadd.f32 %v1146_v34, %v4419_v45  ;;  %v3315_v10 = vpop.f32.mrb[79].mxu1 }
 0x18a   : > { %v4593_v56 = vadd.f32 %v1432_v55, %v1210_v54  ;;  %v3359_v0 = vpop.f32.mrb[79].mxu0 }
 0x18b   : > { %3525 = vmatmul.mubr.msk.bf16.gmra.mrb[184].mxu1 %vm409_vm2, %v2110_v44 }
 0x18c   : > { %3569 = vmatmul.mubr.msk.bf16.gmra.mrb[184].mxu0 %vm409_vm2, %v2331_v22  ;;  %3528 = vmatprep.mubr.msk.bf16.mxu1 %vm3708_vm0, %v3707_v1 }
 0x18d   : > { %3572 = vmatprep.mubr.msk.bf16.mxu0 %vm3708_vm0, %v3707_v1 }
 0x18e   : > { %v1151_v63 = vpop.f32.mrb[80].mxu1 }
 0x18f   : > { %v1437_v14 = vpop.f32.mrb[80].mxu0  ;;  %v1213_v6 = vadd.f32 %v1151_v63, %v4434_v50  ;;  %v3318_v9 = vpop.f32.mrb[81].mxu1 }
 0x190   : > { %v4604_v21 = vadd.f32 %v1437_v14, %v1211_v27  ;;  %v3362_v41 = vpop.f32.mrb[81].mxu0  ;;  %v1154_v11 = vpop.f32.mrb[82].mxu1 }
 0x191   : > { %v1440_v45 = vpop.f32.mrb[82].mxu0  ;;  %v1214_v2 = vadd.f32 %v1154_v11, %v4438_v32  ;;  %v3319_v33 = vpop.f32.mrb[83].mxu1  ;;  %v2335_v32 = vsel %vm1018_vm4, %v2332_v42, %v2334_v20 }
 0x192   : > { %v4608_v51 = vadd.f32 %v1440_v45, %v1212_v36  ;;  %v3363_v17 = vpop.f32.mrb[83].mxu0 }
 0x193   : > { %3529 = vmatmul.mubr.msk.bf16.gmra.mrb[188].mxu1 %vm409_vm2, %v2119_v19 }
 0x194   : > { %3573 = vmatmul.mubr.msk.bf16.gmra.mrb[188].mxu0 %vm409_vm2, %v2333_v5  ;;  %3532 = vmatprep.mubr.msk.bf16.mxu1 %vm3708_vm0, %v3707_v1 }
 0x195   : > { %3576 = vmatprep.mubr.msk.bf16.mxu0 %vm3708_vm0, %v3707_v1 }
 0x196   : > { %v1159_v37 = vpop.f32.mrb[84].mxu1 }
 0x197   : > { %v1445_v50 = vpop.f32.mrb[84].mxu0  ;;  %v1215_v39 = vadd.f32 %v1159_v37, %v4452_v47  ;;  %v3322_v40 = vpop.f32.mrb[85].mxu1 }
 0x198   : > { %v4619_v13 = vadd.f32 %v1445_v50, %v1213_v6  ;;  %v3366_v4 = vpop.f32.mrb[85].mxu0  ;;  %v1162_v15 = vpop.f32.mrb[86].mxu1 }
 0x199   : > { %v1448_v25 = vpop.f32.mrb[86].mxu0  ;;  %v1216_v12 = vadd.f32 %v1162_v15, %v4456_v59  ;;  %v3323_v48 = vpop.f32.mrb[87].mxu1 }
 0x19a   : > { %v4623_v54 = vadd.f32 %v1448_v25, %v1214_v2  ;;  %v3367_v35 = vpop.f32.mrb[87].mxu0 }
 0x19b   : > { %3533 = vmatmul.mubr.msk.bf16.gmra.mrb[192].mxu1 %vm409_vm2, %v2118_v3 }
 0x19c   : > { %3577 = vmatmul.mubr.msk.bf16.gmra.mrb[192].mxu0 %vm409_vm2, %v2335_v32 }
 0x19d   : > { %3580 = vmatprep.mubr.msk.bf16.mxu0 %vm3708_vm0, %v3707_v1 }
 0x19e   : > { %v1167_v47 = vpop.f32.mrb[88].mxu1 }
 0x19f   : > { %v1453_v57 = vpop.f32.mrb[88].mxu0  ;;  %v1217_v53 = vadd.f32 %v1167_v47, %v4469_v8  ;;  %v3326_v55 = vpop.f32.mrb[89].mxu1 }
 0x1a0   : > { %v4630_v49 = vadd.f32 %v1453_v57, %v1215_v39  ;;  %v3370_v16 = vpop.f32.mrb[89].mxu0  ;;  %v1170_v27 = vpop.f32.mrb[90].mxu1 }
 0x1a1   : > { %v1456_v29 = vpop.f32.mrb[90].mxu0  ;;  %v1218_v60 = vadd.f32 %v1170_v27, %v4473_v61  ;;  %v3327_v1 = vpop.f32.mrb[91].mxu1 }
 0x1a2   : > { %v4633_v22 = vadd.f32 %v1456_v29, %v1216_v12  ;;  %v3371_v59 = vpop.f32.mrb[91].mxu0 }
 0x1a4   : > { %3581 = vmatmul.mubr.msk.bf16.gmra.mrb[196].mxu0 %vm409_vm2, %v2334_v20 }
 0x1a6   : > { %v1175_v28 = vpop.f32.mrb[92].mxu1 }
 0x1a7   : > { %v1461_v0 = vpop.f32.mrb[92].mxu0  ;;  %v1219_v36 = vadd.f32 %v1175_v28, %v4486_v38  ;;  %v3330_v10 = vpop.f32.mrb[93].mxu1 }
 0x1a8   : > { %v4637_v34 = vadd.f32 %v1461_v0, %v1217_v53  ;;  %v3374_v44 = vpop.f32.mrb[93].mxu0  ;;  %v1178_v14 = vpop.f32.mrb[94].mxu1 }
 0x1a9   : > { %v1464_v62 = vpop.f32.mrb[94].mxu0  ;;  %v1220_v3 = vadd.f32 %v1178_v14, %v4490_v43  ;;  %v3331_v41 = vpop.f32.mrb[95].mxu1 }
 0x1aa   : > { %v4640_v8 = vadd.f32 %v1464_v62, %v1218_v60  ;;  %v3375_v42 = vpop.f32.mrb[95].mxu0 }
 0x1ae   : > { %v1183_v5 = vpop.f32.mrb[96].mxu1 }
 0x1af   : > { %v1469_v61 = vpop.f32.mrb[96].mxu0  ;;  %v1221_v9 = vadd.f32 %v1183_v5, %v4503_v52  ;;  %v3334_v17 = vpop.f32.mrb[97].mxu1 }
 0x1b0   : > { %v4643_v63 = vadd.f32 %v1469_v61, %v1219_v36  ;;  %v3378_v45 = vpop.f32.mrb[97].mxu0  ;;  %v1186_v19 = vpop.f32.mrb[98].mxu1 }
 0x1b1   : > { %v1472_v6 = vpop.f32.mrb[98].mxu0  ;;  %v1222_v2 = vadd.f32 %v1186_v19, %v4507_v58  ;;  %v3335_v33 = vpop.f32.mrb[99].mxu1 }
 0x1b2   : > { %v4646_v11 = vadd.f32 %v1472_v6, %v1220_v3  ;;  %v3379_v38 = vpop.f32.mrb[99].mxu0 }
 0x1b6   : > { %v1191_v4 = vpop.f32.mrb[100].mxu1 }
 0x1b7   : > { %v1477_v20 = vpop.f32.mrb[100].mxu0  ;;  %v1223_v25 = vadd.f32 %v1191_v4, %v4520_v18  ;;  %v3338_v32 = vpop.f32.mrb[101].mxu1 }
 0x1b8   : > { %v4649_v50 = vadd.f32 %v1477_v20, %v1221_v9  ;;  %v3382_v43 = vpop.f32.mrb[101].mxu0  ;;  %v1194_v40 = vpop.f32.mrb[102].mxu1 }
 0x1b9   : > { %v1480_v37 = vpop.f32.mrb[102].mxu0  ;;  %v1224_v35 = vadd.f32 %v1194_v40, %v4524_v31  ;;  %v3339_v15 = vpop.f32.mrb[103].mxu1 }
 0x1ba   : > { %v4652_v39 = vadd.f32 %v1480_v37, %v1222_v2  ;;  %v3383_v52 = vpop.f32.mrb[103].mxu0 }
 0x1be   : > { %v1199_v57 = vpop.f32.mrb[104].mxu1 }
 0x1bf   : > { %v1485_v12 = vpop.f32.mrb[104].mxu0  ;;  %v1225_v47 = vadd.f32 %v1199_v57, %v4536_v30  ;;  %v3342_v18 = vpop.f32.mrb[105].mxu1 }
 0x1c0   : > { %v4655_v48 = vadd.f32 %v1485_v12, %v1223_v25  ;;  %v3386_v58 = vpop.f32.mrb[105].mxu0  ;;  %v1202_v55 = vpop.f32.mrb[106].mxu1 }
 0x1c1   : > { %v1488_v16 = vpop.f32.mrb[106].mxu0  ;;  %v3343_v59 = vpop.f32.mrb[107].mxu1 }
 0x1c2   : > { %v4658_v29 = vadd.f32 %v1488_v16, %v1224_v35  ;;  %v3387_v53 = vpop.f32.mrb[107].mxu0 }
 0x1c6   : > { %v1615_v31 = vpop.f32.mrb[108].mxu1 }
 0x1c7   : > { %v1493_v27 = vpop.f32.mrb[108].mxu0  ;;  %v1701_v44 = vadd.f32 %v1615_v31, %v4551_v26  ;;  %v3398_v28 = vpop.f32.mrb[109].mxu1 }
 0x1c8   : > { %v4660_v60 = vadd.f32 %v1493_v27, %v1225_v47  ;;  %v3390_v1 = vpop.f32.mrb[109].mxu0  ;;  %v1618_v36 = vpop.f32.mrb[110].mxu1 }
 0x1c9   : > { %v1496_v0 = vpop.f32.mrb[110].mxu0  ;;  %v1702_v10 = vadd.f32 %v1618_v36, %v4555_v23  ;;  %v3399_v30 = vpop.f32.mrb[111].mxu1 }
 0x1ca   : > { %v3391_v62 = vpop.f32.mrb[111].mxu0 }
 0x1ce   : > { %v1623_v41 = vpop.f32.mrb[112].mxu1 }
 0x1cf   : > { %v1905_v42 = vpop.f32.mrb[112].mxu0  ;;  %v1703_v45 = vadd.f32 %v1623_v41, %v4569_v7  ;;  %v3402_v5 = vpop.f32.mrb[113].mxu1 }
 0x1d0   : > { %v4664_v14 = vadd.f32 %v1905_v42, %v1701_v44  ;;  %v3446_v3 = vpop.f32.mrb[113].mxu0  ;;  %v1626_v17 = vpop.f32.mrb[114].mxu1 }
 0x1d1   : > { %v1908_v61 = vpop.f32.mrb[114].mxu0  ;;  %v1704_v26 = vadd.f32 %v1626_v17, %v4573_v46  ;;  %v3403_v38 = vpop.f32.mrb[115].mxu1 }
 0x1d2   : > { %v4667_v6 = vadd.f32 %v1908_v61, %v1702_v10  ;;  %v3447_v9 = vpop.f32.mrb[115].mxu0 }
 0x1d6   : > { %v1631_v33 = vpop.f32.mrb[116].mxu1 }
 0x1d7   : > { %v1913_v19 = vpop.f32.mrb[116].mxu0  ;;  %v1705_v43 = vadd.f32 %v1631_v33, %v4589_v24  ;;  %v3406_v4 = vpop.f32.mrb[117].mxu1 }
 0x1d8   : > { %v4670_v2 = vadd.f32 %v1913_v19, %v1703_v45  ;;  %v3450_v23 = vpop.f32.mrb[117].mxu0  ;;  %v1634_v25 = vpop.f32.mrb[118].mxu1 }
 0x1d9   : > { %v1916_v20 = vpop.f32.mrb[118].mxu0  ;;  %v1706_v32 = vadd.f32 %v1634_v25, %v4593_v56  ;;  %v3407_v52 = vpop.f32.mrb[119].mxu1 }
 0x1da   : > { %v4673_v37 = vadd.f32 %v1916_v20, %v1704_v26  ;;  %v3451_v7 = vpop.f32.mrb[119].mxu0 }
 0x1de   : > { %v1639_v15 = vpop.f32.mrb[120].mxu1 }
 0x1df   : > { %v1921_v40 = vpop.f32.mrb[120].mxu0  ;;  %v1707_v58 = vadd.f32 %v1639_v15, %v4604_v21  ;;  %v3410_v57 = vpop.f32.mrb[121].mxu1 }
 0x1e0   : > { %v4676_v35 = vadd.f32 %v1921_v40, %v1705_v43  ;;  %v3454_v46 = vpop.f32.mrb[121].mxu0  ;;  %v1642_v47 = vpop.f32.mrb[122].mxu1 }
 0x1e1   : > { %v1924_v12 = vpop.f32.mrb[122].mxu0  ;;  %v1708_v53 = vadd.f32 %v1642_v47, %v4608_v51  ;;  %v3411_v18 = vpop.f32.mrb[123].mxu1 }
 0x1e2   : > { %v4679_v16 = vadd.f32 %v1924_v12, %v1706_v32  ;;  %v3455_v24 = vpop.f32.mrb[123].mxu0 }
 0x1e6   : > { %v1647_v27 = vpop.f32.mrb[124].mxu1 }
 0x1e7   : > { %v1929_v55 = vpop.f32.mrb[124].mxu0  ;;  %v1709_v31 = vadd.f32 %v1647_v27, %v4619_v13  ;;  %v3414_v0 = vpop.f32.mrb[125].mxu1 }
 0x1e8   : > { %v4682_v59 = vadd.f32 %v1929_v55, %v1707_v58  ;;  %v3458_v56 = vpop.f32.mrb[125].mxu0  ;;  %v1650_v28 = vpop.f32.mrb[126].mxu1 }
 0x1e9   : > { %v1932_v1 = vpop.f32.mrb[126].mxu0  ;;  %v1710_v62 = vadd.f32 %v1650_v28, %v4623_v54  ;;  %v3415_v36 = vpop.f32.mrb[127].mxu1 }
 0x1ea   : > { %v4685_v44 = vadd.f32 %v1932_v1, %v1708_v53  ;;  %v3459_v21 = vpop.f32.mrb[127].mxu0 }
 0x1ee   : > { %v1655_v42 = vpop.f32.mrb[128].mxu1 }
 0x1ef   : > { %v1937_v10 = vpop.f32.mrb[128].mxu0  ;;  %v1711_v41 = vadd.f32 %v1655_v42, %v4630_v49  ;;  %v3418_v61 = vpop.f32.mrb[129].mxu1 }
 0x1f0   : > { %v4688_v30 = vadd.f32 %v1937_v10, %v1709_v31  ;;  %v3462_v51 = vpop.f32.mrb[129].mxu0  ;;  %v1658_v5 = vpop.f32.mrb[130].mxu1 }
 0x1f1   : > { %v1940_v3 = vpop.f32.mrb[130].mxu0  ;;  %v1712_v9 = vadd.f32 %v1658_v5, %v4633_v22  ;;  %v3419_v17 = vpop.f32.mrb[131].mxu1 }
 0x1f2   : > { %v4691_v45 = vadd.f32 %v1940_v3, %v1710_v62  ;;  %v3463_v13 = vpop.f32.mrb[131].mxu0 }
 0x1f6   : > { %v1663_v19 = vpop.f32.mrb[132].mxu1 }
 0x1f7   : > { %v1945_v26 = vpop.f32.mrb[132].mxu0  ;;  %v1713_v33 = vadd.f32 %v1663_v19, %v4637_v34  ;;  %v3422_v20 = vpop.f32.mrb[133].mxu1 }
 0x1f8   : > { %v4694_v38 = vadd.f32 %v1945_v26, %v1711_v41  ;;  %v3466_v54 = vpop.f32.mrb[133].mxu0  ;;  %v1666_v4 = vpop.f32.mrb[134].mxu1 }
 0x1f9   : > { %v1948_v23 = vpop.f32.mrb[134].mxu0  ;;  %v1714_v7 = vadd.f32 %v1666_v4, %v4640_v8  ;;  %v3423_v25 = vpop.f32.mrb[135].mxu1 }
 0x1fa   : > { %v4697_v43 = vadd.f32 %v1948_v23, %v1712_v9  ;;  %v3467_v49 = vpop.f32.mrb[135].mxu0 }
 0x1fe   : > { %v1671_v40 = vpop.f32.mrb[136].mxu1 }
 0x1ff   : > { %v1953_v32 = vpop.f32.mrb[136].mxu0  ;;  %v1715_v15 = vadd.f32 %v1671_v40, %v4643_v63  ;;  %v3426_v12 = vpop.f32.mrb[137].mxu1 }
 0x200   : > { %v4700_v52 = vadd.f32 %v1953_v32, %v1713_v33  ;;  %v3470_v22 = vpop.f32.mrb[137].mxu0  ;;  %v1674_v57 = vpop.f32.mrb[138].mxu1 }
 0x201   : > { %v1956_v46 = vpop.f32.mrb[138].mxu0  ;;  %v1716_v24 = vadd.f32 %v1674_v57, %v4646_v11  ;;  %v3427_v47 = vpop.f32.mrb[139].mxu1  ;;  %v4730_v57 = vld [vmem:[%s4831_s2] ss:$0 sm:$0xff] }
 0x202   : > { %v4703_v58 = vadd.f32 %v1956_v46, %v1714_v7  ;;  %v3471_v34 = vpop.f32.mrb[139].mxu0 }
 0x206   : > { %v1679_v55 = vpop.f32.mrb[140].mxu1 }
 0x207   : > { %v1961_v53 = vpop.f32.mrb[140].mxu0  ;;  %v1717_v27 = vadd.f32 %v1679_v55, %v4649_v50  ;;  %v3430_v1 = vpop.f32.mrb[141].mxu1 }
 0x208   : > { %v4706_v18 = vadd.f32 %v1961_v53, %v1715_v15  ;;  %v3474_v8 = vpop.f32.mrb[141].mxu0  ;;  %v1682_v0 = vpop.f32.mrb[142].mxu1 }
 0x209   : > { %v1964_v56 = vpop.f32.mrb[142].mxu0  ;;  %v1718_v21 = vadd.f32 %v1682_v0, %v4652_v39  ;;  %v3431_v28 = vpop.f32.mrb[143].mxu1 }
 0x20a   : > { %v4709_v31 = vadd.f32 %v1964_v56, %v1716_v24  ;;  %v3475_v63 = vpop.f32.mrb[143].mxu0 }
 0x20e   : > { %v1687_v10 = vpop.f32.mrb[144].mxu1 }
 0x20f   : > { %v1969_v62 = vpop.f32.mrb[144].mxu0  ;;  %v1719_v42 = vadd.f32 %v1687_v10, %v4655_v48  ;;  %v3434_v3 = vpop.f32.mrb[145].mxu1 }
 0x210   : > { %v4712_v36 = vadd.f32 %v1969_v62, %v1717_v27  ;;  %v3478_v11 = vpop.f32.mrb[145].mxu0  ;;  %v1690_v61 = vpop.f32.mrb[146].mxu1 }
 0x211   : > { %v1972_v51 = vpop.f32.mrb[146].mxu0  ;;  %v1720_v13 = vadd.f32 %v1690_v61, %v4658_v29  ;;  %v3435_v5 = vpop.f32.mrb[147].mxu1 }
 0x212   : > { %v4715_v41 = vadd.f32 %v1972_v51, %v1718_v21  ;;  %v3479_v50 = vpop.f32.mrb[147].mxu0 }
 0x216   : > { %v1695_v26 = vpop.f32.mrb[148].mxu1 }
 0x217   : > { %v1977_v9 = vpop.f32.mrb[148].mxu0  ;;  %v1721_v19 = vadd.f32 %v1695_v26, %v4660_v60  ;;  %v3438_v48 = vpop.f32.mrb[149].mxu1 }
 0x218   : > { %v4718_v17 = vadd.f32 %v1977_v9, %v1719_v42  ;;  %v3482_v39 = vpop.f32.mrb[149].mxu0  ;;  %v1698_v20 = vpop.f32.mrb[150].mxu1 }
 0x219   : > { %v1980_v54 = vpop.f32.mrb[150].mxu0  ;;  %v3439_v49 = vpop.f32.mrb[151].mxu1 }
 0x21a   : > { %v4721_v23 = vadd.f32 %v1980_v54, %v1720_v13  ;;  %v3483_v33 = vpop.f32.mrb[151].mxu0 }
 0x21e   : > { %v2199_v25 = vpop.f32.mrb[152].mxu1 }
 0x21f   : > { %v1985_v4 = vpop.f32.mrb[152].mxu0  ;;  %v2285_v22 = vadd.f32 %v2199_v25, %v4664_v14  ;;  %v3494_v40 = vpop.f32.mrb[153].mxu1 }
 0x220   : > { %v4723_v7 = vadd.f32 %v1985_v4, %v1721_v19  ;;  %v3486_v29 = vpop.f32.mrb[153].mxu0  ;;  %v2202_v15 = vpop.f32.mrb[154].mxu1 }
 0x221   : > { %v1988_v32 = vpop.f32.mrb[154].mxu0  ;;  %v2286_v60 = vadd.f32 %v2202_v15, %v4667_v6  ;;  %v3495_v12 = vpop.f32.mrb[155].mxu1 }
 0x222   : > { %v3487_v46 = vpop.f32.mrb[155].mxu0 }
 0x226   : > { %v2207_v53 = vpop.f32.mrb[156].mxu1 }
 0x227   : > { %v2415_v34 = vpop.f32.mrb[156].mxu0  ;;  %v2287_v55 = vadd.f32 %v2207_v53, %v4670_v2  ;;  %v3498_v56 = vpop.f32.mrb[157].mxu1 }
 0x228   : > { %v2501_v24 = vadd.f32 %v2415_v34, %v2285_v22  ;;  %v3542_v47 = vpop.f32.mrb[157].mxu0  ;;  %v2210_v6 = vpop.f32.mrb[158].mxu1 }
 0x229   : > { %v2418_v8 = vpop.f32.mrb[158].mxu0  ;;  %v2288_v0 = vadd.f32 %v2210_v6, %v4673_v37  ;;  %v3499_v28 = vpop.f32.mrb[159].mxu1 }
 0x22a   : > { %v2529_v14 = vadd.f32 %v4730_v57, %v2501_v24  ;;  %v2502_v27 = vadd.f32 %v2418_v8, %v2286_v60  ;;  %v3543_v1 = vpop.f32.mrb[159].mxu0 }
 0x22c   : > { %v2550_v63 = vmax.f32 %v2529_v14, 0.0  ;;  %v2530_v21 = vadd.f32 %v4730_v57, %v2502_v27 }
 0x22e   : > { %v3014_v2 = vpack.c.bf16 %v2550_v63, %v2550_v63  ;;  %v2551_v62 = vmax.f32 %v2530_v21, 0.0  ;;  %v2215_v37 = vpop.f32.mrb[160].mxu1 }
 0x22f   : > { %v2423_v11 = vpop.f32.mrb[160].mxu0  ;;  %v2289_v50 = vadd.f32 %v2215_v37, %v4676_v35  ;;  %v3502_v13 = vpop.f32.mrb[161].mxu1 }
 0x230   : > { %2657 = vst.msk [vmem:[%s4740_s11] sm:$0xf] %vm2656_vm8, %v3014_v2  ;;  %v3015_v10 = vpack.c.bf16 %v2551_v62, %v2551_v62  ;;  %v2503_v51 = vadd.f32 %v2423_v11, %v2287_v55  ;;  %v3546_v42 = vpop.f32.mrb[161].mxu0  ;;  %v2218_v39 = vpop.f32.mrb[162].mxu1 }
 0x231   : > { %v2426_v3 = vpop.f32.mrb[162].mxu0  ;;  %v2290_v54 = vadd.f32 %v2218_v39, %v4679_v16  ;;  %v3503_v33 = vpop.f32.mrb[163].mxu1 }
 0x232   : > { %2658 = vst.msk [vmem:[%s4740_s11 + $0x4] sm:$0xf] %vm2656_vm8, %v3015_v10  ;;  %v2531_v61 = vadd.f32 %v4730_v57, %v2503_v51  ;;  %v2504_v5 = vadd.f32 %v2426_v3, %v2288_v0  ;;  %v3547_v9 = vpop.f32.mrb[163].mxu0 }
 0x234   : > { %v2552_v26 = vmax.f32 %v2531_v61, 0.0  ;;  %v2532_v19 = vadd.f32 %v4730_v57, %v2504_v5 }
 0x236   : > { %v3016_v48 = vpack.c.bf16 %v2552_v26, %v2552_v26  ;;  %v2553_v20 = vmax.f32 %v2532_v19, 0.0  ;;  %v2223_v25 = vpop.f32.mrb[164].mxu1 }
 0x237   : > { %v2431_v49 = vpop.f32.mrb[164].mxu0  ;;  %v2291_v22 = vadd.f32 %v2223_v25, %v4682_v59  ;;  %v3506_v40 = vpop.f32.mrb[165].mxu1 }
 0x238   : > { %2659 = vst.msk [vmem:[%s4740_s11 + $0x8] sm:$0xf] %vm2656_vm8, %v3016_v48  ;;  %v3017_v4 = vpack.c.bf16 %v2553_v20, %v2553_v20  ;;  %v2505_v35 = vadd.f32 %v2431_v49, %v2289_v50  ;;  %v3550_v29 = vpop.f32.mrb[165].mxu0  ;;  %v2226_v60 = vpop.f32.mrb[166].mxu1 }
 0x239   : > { %v2434_v32 = vpop.f32.mrb[166].mxu0  ;;  %v2292_v34 = vadd.f32 %v2226_v60, %v4685_v44  ;;  %v3507_v47 = vpop.f32.mrb[167].mxu1 }
 0x23a   : > { %2660 = vst.msk [vmem:[%s4740_s11 + $0xc] sm:$0xf] %vm2656_vm8, %v3017_v4  ;;  %v2533_v16 = vadd.f32 %v4730_v57, %v2505_v35  ;;  %v2506_v46 = vadd.f32 %v2434_v32, %v2290_v54  ;;  %v3551_v15 = vpop.f32.mrb[167].mxu0 }
 0x23c   : > { %v2554_v12 = vmax.f32 %v2533_v16, 0.0  ;;  %v2534_v24 = vadd.f32 %v4730_v57, %v2506_v46 }
 0x23e   : > { %v3018_v53 = vpack.c.bf16 %v2554_v12, %v2554_v12  ;;  %v2555_v8 = vmax.f32 %v2534_v24, 0.0  ;;  %v2231_v27 = vpop.f32.mrb[168].mxu1 }
 0x23f   : > { %v2439_v55 = vpop.f32.mrb[168].mxu0  ;;  %v2293_v6 = vadd.f32 %v2231_v27, %v4688_v30  ;;  %v3510_v63 = vpop.f32.mrb[169].mxu1 }
 0x240   : > { %2661 = vst.msk [vmem:[%s4740_s11 + $0x10] sm:$0xf] %vm2656_vm8, %v3018_v53  ;;  %v3019_v14 = vpack.c.bf16 %v2555_v8, %v2555_v8  ;;  %v2507_v59 = vadd.f32 %v2439_v55, %v2291_v22  ;;  %v3554_v56 = vpop.f32.mrb[169].mxu0  ;;  %v2234_v28 = vpop.f32.mrb[170].mxu1 }
 0x241   : > { %v2442_v1 = vpop.f32.mrb[170].mxu0  ;;  %v2294_v62 = vadd.f32 %v2234_v28, %v4691_v45  ;;  %v3511_v10 = vpop.f32.mrb[171].mxu1 }
 0x242   : > { %2662 = vst.msk [vmem:[%s4740_s11 + $0x14] sm:$0xf] %vm2656_vm8, %v3019_v14  ;;  %v2535_v44 = vadd.f32 %v4730_v57, %v2507_v59  ;;  %v2508_v0 = vadd.f32 %v2442_v1, %v2292_v34  ;;  %v3555_v21 = vpop.f32.mrb[171].mxu0 }
 0x244   : > { %v2556_v2 = vmax.f32 %v2535_v44, 0.0  ;;  %v2536_v11 = vadd.f32 %v4730_v57, %v2508_v0 }
 0x246   : > { %v3020_v51 = vpack.c.bf16 %v2556_v2, %v2556_v2  ;;  %v2557_v42 = vmax.f32 %v2536_v11, 0.0  ;;  %v2239_v61 = vpop.f32.mrb[172].mxu1 }
 0x247   : > { %v2447_v37 = vpop.f32.mrb[172].mxu0  ;;  %v2295_v5 = vadd.f32 %v2239_v61, %v4694_v38  ;;  %v3514_v9 = vpop.f32.mrb[173].mxu1 }
 0x248   : > { %2663 = vst.msk [vmem:[%s4740_s11 + $0x18] sm:$0xf] %vm2656_vm8, %v3020_v51  ;;  %v3021_v3 = vpack.c.bf16 %v2557_v42, %v2557_v42  ;;  %v2509_v30 = vadd.f32 %v2447_v37, %v2293_v6  ;;  %v3558_v50 = vpop.f32.mrb[173].mxu0  ;;  %v2242_v54 = vpop.f32.mrb[174].mxu1 }
 0x249   : > { %v2450_v13 = vpop.f32.mrb[174].mxu0  ;;  %v2296_v33 = vadd.f32 %v2242_v54, %v4697_v43  ;;  %v3515_v20 = vpop.f32.mrb[175].mxu1 }
 0x24a   : > { %2664 = vst.msk [vmem:[%s4740_s11 + $0x1c] sm:$0xf] %vm2656_vm8, %v3021_v3  ;;  %v2537_v45 = vadd.f32 %v4730_v57, %v2509_v30  ;;  %v2510_v39 = vadd.f32 %v2450_v13, %v2294_v62  ;;  %v3559_v26 = vpop.f32.mrb[175].mxu0 }
 0x24c   : > { %v2558_v19 = vmax.f32 %v2537_v45, 0.0  ;;  %v2538_v48 = vadd.f32 %v4730_v57, %v2510_v39 }
 0x24e   : > { %v3022_v49 = vpack.c.bf16 %v2558_v19, %v2558_v19  ;;  %v2559_v4 = vmax.f32 %v2538_v48, 0.0  ;;  %v2247_v32 = vpop.f32.mrb[176].mxu1 }
 0x24f   : > { %v2455_v35 = vpop.f32.mrb[176].mxu0  ;;  %v2297_v16 = vadd.f32 %v2247_v32, %v4700_v52  ;;  %v3518_v40 = vpop.f32.mrb[177].mxu1 }
 0x250   : > { %2665 = vst.msk [vmem:[%s4740_s11 + $0x20] sm:$0xf] %vm2656_vm8, %v3022_v49  ;;  %v3023_v29 = vpack.c.bf16 %v2559_v4, %v2559_v4  ;;  %v2511_v38 = vadd.f32 %v2455_v35, %v2295_v5  ;;  %v3562_v25 = vpop.f32.mrb[177].mxu0  ;;  %v2250_v60 = vpop.f32.mrb[178].mxu1 }
 0x251   : > { %v2458_v22 = vpop.f32.mrb[178].mxu0  ;;  %v2298_v34 = vadd.f32 %v2250_v60, %v4703_v58  ;;  %v3519_v47 = vpop.f32.mrb[179].mxu1 }
 0x252   : > { %2666 = vst.msk [vmem:[%s4740_s11 + $0x24] sm:$0xf] %vm2656_vm8, %v3023_v29  ;;  %v2539_v43 = vadd.f32 %v4730_v57, %v2511_v38  ;;  %v2512_v46 = vadd.f32 %v2458_v22, %v2296_v33  ;;  %v3563_v15 = vpop.f32.mrb[179].mxu0 }
 0x254   : > { %v2560_v12 = vmax.f32 %v2539_v43, 0.0  ;;  %v2540_v24 = vadd.f32 %v4730_v57, %v2512_v46 }
 0x256   : > { %v3024_v53 = vpack.c.bf16 %v2560_v12, %v2560_v12  ;;  %v2561_v8 = vmax.f32 %v2540_v24, 0.0  ;;  %v2255_v56 = vpop.f32.mrb[180].mxu1 }
 0x257   : > { %v2463_v55 = vpop.f32.mrb[180].mxu0  ;;  %v2299_v1 = vadd.f32 %v2255_v56, %v4706_v18  ;;  %v3522_v6 = vpop.f32.mrb[181].mxu1 }
 0x258   : > { %2667 = vst.msk [vmem:[%s4740_s11 + $0x28] sm:$0xf] %vm2656_vm8, %v3024_v53  ;;  %v3025_v14 = vpack.c.bf16 %v2561_v8, %v2561_v8  ;;  %v2513_v52 = vadd.f32 %v2463_v55, %v2297_v16  ;;  %v3566_v59 = vpop.f32.mrb[181].mxu0  ;;  %v2258_v0 = vpop.f32.mrb[182].mxu1 }
 0x259   : > { %v2466_v27 = vpop.f32.mrb[182].mxu0  ;;  %v2300_v28 = vadd.f32 %v2258_v0, %v4709_v31  ;;  %v3523_v62 = vpop.f32.mrb[183].mxu1 }
 0x25a   : > { %2668 = vst.msk [vmem:[%s4740_s11 + $0x2c] sm:$0xf] %vm2656_vm8, %v3025_v14  ;;  %v2541_v58 = vadd.f32 %v4730_v57, %v2513_v52  ;;  %v2514_v44 = vadd.f32 %v2466_v27, %v2298_v34  ;;  %v3567_v63 = vpop.f32.mrb[183].mxu0 }
 0x25c   : > { %v2562_v21 = vmax.f32 %v2541_v58, 0.0  ;;  %v2542_v2 = vadd.f32 %v4730_v57, %v2514_v44 }
 0x25e   : > { %v3026_v11 = vpack.c.bf16 %v2562_v21, %v2562_v21  ;;  %v2563_v10 = vmax.f32 %v2542_v2, 0.0  ;;  %v2263_v3 = vpop.f32.mrb[184].mxu1 }
 0x25f   : > { %v2471_v51 = vpop.f32.mrb[184].mxu0  ;;  %v2301_v50 = vadd.f32 %v2263_v3, %v4712_v36  ;;  %v3526_v61 = vpop.f32.mrb[185].mxu1 }
 0x260   : > { %2669 = vst.msk [vmem:[%s4740_s11 + $0x30] sm:$0xf] %vm2656_vm8, %v3026_v11  ;;  %v3027_v42 = vpack.c.bf16 %v2563_v10, %v2563_v10  ;;  %v2515_v18 = vadd.f32 %v2471_v51, %v2299_v1  ;;  %v3570_v37 = vpop.f32.mrb[185].mxu0  ;;  %v2266_v45 = vpop.f32.mrb[186].mxu1 }
 0x261   : > { %v2474_v30 = vpop.f32.mrb[186].mxu0  ;;  %v2302_v39 = vadd.f32 %v2266_v45, %v4715_v41  ;;  %v3527_v54 = vpop.f32.mrb[187].mxu1 }
 0x262   : > { %2670 = vst.msk [vmem:[%s4740_s11 + $0x34] sm:$0xf] %vm2656_vm8, %v3027_v42  ;;  %v2543_v31 = vadd.f32 %v4730_v57, %v2515_v18  ;;  %v2516_v13 = vadd.f32 %v2474_v30, %v2300_v28  ;;  %v3571_v5 = vpop.f32.mrb[187].mxu0 }
 0x264   : > { %v2564_v9 = vmax.f32 %v2543_v31, 0.0  ;;  %v2544_v26 = vadd.f32 %v4730_v57, %v2516_v13 }
 0x266   : > { %v3028_v19 = vpack.c.bf16 %v2564_v9, %v2564_v9  ;;  %v2565_v33 = vmax.f32 %v2544_v26, 0.0  ;;  %v2271_v4 = vpop.f32.mrb[188].mxu1 }
 0x267   : > { %v2479_v48 = vpop.f32.mrb[188].mxu0  ;;  %v2303_v29 = vadd.f32 %v2271_v4, %v4718_v17  ;;  %v3530_v38 = vpop.f32.mrb[189].mxu1 }
 0x268   : > { %2671 = vst.msk [vmem:[%s4740_s11 + $0x38] sm:$0xf] %vm2656_vm8, %v3028_v19  ;;  %v3029_v20 = vpack.c.bf16 %v2565_v33, %v2565_v33  ;;  %v2517_v36 = vadd.f32 %v2479_v48, %v2301_v50  ;;  %v3574_v49 = vpop.f32.mrb[189].mxu0  ;;  %v2274_v22 = vpop.f32.mrb[190].mxu1 }
 0x269   : > { %v2482_v35 = vpop.f32.mrb[190].mxu0  ;;  %v2304_v43 = vadd.f32 %v2274_v22, %v4721_v23  ;;  %v3531_v46 = vpop.f32.mrb[191].mxu1 }
 0x26a   : > { %2672 = vst.msk [vmem:[%s4740_s11 + $0x3c] sm:$0xf] %vm2656_vm8, %v3029_v20  ;;  %v2545_v41 = vadd.f32 %v4730_v57, %v2517_v36  ;;  %v2518_v25 = vadd.f32 %v2482_v35, %v2302_v39  ;;  %v3575_v32 = vpop.f32.mrb[191].mxu0 }
 0x26c   : > { %v2566_v16 = vmax.f32 %v2545_v41, 0.0  ;;  %v2546_v40 = vadd.f32 %v4730_v57, %v2518_v25 }
 0x26e   : > { %v3030_v15 = vpack.c.bf16 %v2566_v16, %v2566_v16  ;;  %v2567_v60 = vmax.f32 %v2546_v40, 0.0  ;;  %v2279_v47 = vpop.f32.mrb[192].mxu1 }
 0x26f   : > { %v2487_v12 = vpop.f32.mrb[192].mxu0  ;;  %v2305_v8 = vadd.f32 %v2279_v47, %v4723_v7  ;;  %v3534_v52 = vpop.f32.mrb[193].mxu1 }
 0x270   : > { %2673 = vst.msk [vmem:[%s4740_s11 + $0x40] sm:$0xf] %vm2656_vm8, %v3030_v15  ;;  %v3031_v34 = vpack.c.bf16 %v2567_v60, %v2567_v60  ;;  %v2519_v17 = vadd.f32 %v2487_v12, %v2303_v29  ;;  %v3578_v24 = vpop.f32.mrb[193].mxu0  ;;  %v2282_v59 = vpop.f32.mrb[194].mxu1 }
 0x271   : > { %v2490_v53 = vpop.f32.mrb[194].mxu0  ;;  %v3535_v1 = vpop.f32.mrb[195].mxu1 }
 0x272   : > { %2674 = vst.msk [vmem:[%s4740_s11 + $0x44] sm:$0xf] %vm2656_vm8, %v3031_v34  ;;  %v2547_v23 = vadd.f32 %v4730_v57, %v2519_v17  ;;  %v2520_v55 = vadd.f32 %v2490_v53, %v2304_v43  ;;  %v3579_v14 = vpop.f32.mrb[195].mxu0 }
 0x274   : > { %v2568_v56 = vmax.f32 %v2547_v23, 0.0  ;;  %v2548_v27 = vadd.f32 %v4730_v57, %v2520_v55 }
 0x276   : > { %v3032_v58 = vpack.c.bf16 %v2568_v56, %v2568_v56  ;;  %v2569_v6 = vmax.f32 %v2548_v27, 0.0 }
 0x277   : > { %v2495_v44 = vpop.f32.mrb[196].mxu0 }
 0x278   : > { %2675 = vst.msk [vmem:[%s4740_s11 + $0x48] sm:$0xf] %vm2656_vm8, %v3032_v58  ;;  %v3033_v63 = vpack.c.bf16 %v2569_v6, %v2569_v6  ;;  %v2521_v0 = vadd.f32 %v2495_v44, %v2305_v8  ;;  %v3582_v7 = vpop.f32.mrb[197].mxu0 }
 0x279   : > { %v2498_v21 = vpop.f32.mrb[198].mxu0 }
 0x27a   : > { %2676 = vst.msk [vmem:[%s4740_s11 + $0x4c] sm:$0xf] %vm2656_vm8, %v3033_v63  ;;  %v2549_v28 = vadd.f32 %v4730_v57, %v2521_v0  ;;  %v3583_v2 = vpop.f32.mrb[199].mxu0 }
 0x27c   : > { %v2570_v62 = vmax.f32 %v2549_v28, 0.0 }
 0x27e   : > { %v3034_v11 = vpack.c.bf16 %v2570_v62, %v2570_v62 }
 0x280   : > { %2677 = vst.msk [vmem:[%s4740_s11 + $0x50] sm:$0xf] %vm2656_vm8, %v3034_v11 }
 0x281 PF: > { %s13_s14 = sadd.s32 1, %s3705_s14   ;;  %s4833_s12 = smov %s3701_s13 }
 0x282   : > { %p10_p5 = scmp.ge.s32.totalorder %s13_s14, 4   ;;  %s4834_s13 = smov %s4836_s15 }
 0x284   :  { %12 = sbr.rel (!%p10_p5) target bundleno = 2 (0x2), region = 76 }

</bundles_post_ra>
